<compile_context>
chip_gen: v7x
topology: tpu7x:2x2x1
jax: 0.10.0
libtpu: 0.0.40
codegen_flags: <defaults>
</compile_context>

<pallas_src>
import jax
import jax.numpy as jnp
from jax.experimental import pallas as pl
from jax.experimental.pallas import tpu as pltpu


def luong_decoder_kernel(x_ref, h_ref, enc_ref,
                         w_ih_ref, w_hh_ref, b_ih_ref, b_hh_ref,
                         w_cat_rnn_ref, w_cat_ctx_ref, b_cat_ref,
                         w_out_ref, b_out_ref,
                         probs_ref, hnew_ref,
                         cat_ref):
    v = pl.program_id(0)
    num_v = pl.num_programs(0)
    tile_v = w_out_ref.shape[1]

    # ---------- step 0: GRU cell + attention + concat layer (computed once, cached in VMEM) ----------
    @pl.when(v == 0)
    def _():
        x = x_ref[...]          # (B, H)
        h = h_ref[...]          # (B, H)

        def gate(g):
            gi = jnp.dot(x, w_ih_ref[g], preferred_element_type=jnp.float32) + b_ih_ref[g]
            gh = jnp.dot(h, w_hh_ref[g], preferred_element_type=jnp.float32) + b_hh_ref[g]
            return gi, gh

        i_r, h_r = gate(0)
        i_z, h_z = gate(1)
        i_n, h_n = gate(2)
        r = jax.nn.sigmoid(i_r + h_r)
        z = jax.nn.sigmoid(i_z + h_z)
        n = jnp.tanh(i_n + r * h_n)                 # PyTorch GRU: bias_hn inside the r gate
        h_new = (1.0 - z) * n + z * h               # (B, H); single-step GRU output == new hidden
        hnew_ref[...] = h_new

        # Luong 'dot' attention as batched MXU contractions.
        enc = enc_ref[...]                          # (B, L, H)
        q = h_new[:, None, :]                       # (B, 1, H)
        scores = jnp.einsum('bqh,blh->bql', q, enc,
                            preferred_element_type=jnp.float32)          # (B, 1, L)
        m = jnp.max(scores, axis=-1, keepdims=True)
        e = jnp.exp(scores - m)
        attn = e / jnp.sum(e, axis=-1, keepdims=True)                    # exact (one-off cost)
        ctx = jnp.einsum('bql,blh->bqh', attn, enc,
                         preferred_element_type=jnp.float32)[:, 0, :]    # (B, H)

        # concat -> Linear -> tanh, with w_cat split into two (H,H) halves (no lane concat).
        concat_out = jnp.tanh(
            jnp.dot(h_new, w_cat_rnn_ref[...], preferred_element_type=jnp.float32)
            + jnp.dot(ctx, w_cat_ctx_ref[...], preferred_element_type=jnp.float32)
            + b_cat_ref[...])
        cat_ref[...] = concat_out.astype(cat_ref.dtype)   # bf16 for the MXU vocab projection

    # ---------- every step: one (B, TILE_V) slice of the vocab projection ----------
    # probs output block is resident across the grid (constant index_map), so we can use it
    # as the logits accumulator directly -- no separate (B, V) scratch.
    logits = jnp.dot(cat_ref[...], w_out_ref[...], preferred_element_type=jnp.float32)
    off = pl.multiple_of(v * tile_v, tile_v)
    probs_ref[:, pl.ds(off, tile_v)] = logits

    # ---------- last step: bias + global softmax over the full vocab (exact division) ----------
    @pl.when(v == num_v - 1)
    def _():
        full = probs_ref[...] + b_out_ref[...]        # fold bias in once (b_out is VMEM-resident)
        m = jnp.max(full, axis=-1, keepdims=True)
        e = jnp.exp(full - m)
        probs_ref[...] = e / jnp.sum(e, axis=-1, keepdims=True)


def _choose_tile_v(H, V, w_out_budget_bytes=8 * 1024 * 1024):
    """Full-V tile when the (double-buffered) bf16 w_out comfortably fits VMEM, else big tiles."""
    if H * V * 2 <= w_out_budget_bytes:
        return V
    t = min(V, 2048)
    t -= t % 128
    while t > 128 and V % t != 0:
        t -= 128
    return max(t, 128)


def luong_attention_decoder_forward(input_step, last_hidden, encoder_outputs, params, tile_v=None):
    """input_step: (1,B) int32; last_hidden: (1,B,H); encoder_outputs: (L,B,H)."""
    emb_table = params['embedding']                      # (V, H)
    x_emb = emb_table[input_step[0]]                     # (B, H) embedding lookup (wrapper glue)
    h_prev = last_hidden[0]                              # (B, H)
    enc = jnp.transpose(encoder_outputs, (1, 0, 2))      # (B, L, H)

    B, H = h_prev.shape
    L = enc.shape[1]
    V = params['w_out'].shape[1]

    if tile_v is None:
        tile_v = _choose_tile_v(H, V)
    tile_v = min(tile_v, V)
    assert V % tile_v == 0, "V must be a multiple of tile_v"
    num_v = V // tile_v

    # bf16 weights for the dominant (H x V) projection; fp32 accumulation via preferred_element_type.
    w_out_bf16 = params['w_out'].astype(jnp.bfloat16)

    # Rough VMEM budget (x2 for BlockSpec double-buffering of inputs), clamped under v7x's 64 MiB.
    small_w_bytes = (6 * H * H + 6 * H + 2 * H * H + H + V) * 4
    act_bytes = (2 * B * H + B * L * H) * 4
    out_bytes = (B * V + B * H) * 4
    wout_bytes = 2 * H * tile_v * 2
    est = 2 * (small_w_bytes + act_bytes) + out_bytes + wout_bytes + B * H * 2
    vmem_limit = int(min(max(est + (4 << 20), 16 << 20), 48 << 20))

    grid_spec = pltpu.PrefetchScalarGridSpec(
        num_scalar_prefetch=0,
        grid=(num_v,),
        in_specs=[
            pl.BlockSpec((B, H), lambda v: (0, 0)),              # x_emb (resident)
            pl.BlockSpec((B, H), lambda v: (0, 0)),              # h_prev
            pl.BlockSpec((B, L, H), lambda v: (0, 0, 0)),        # enc
            pl.BlockSpec((3, H, H), lambda v: (0, 0, 0)),        # w_ih (per-gate)
            pl.BlockSpec((3, H, H), lambda v: (0, 0, 0)),        # w_hh
            pl.BlockSpec((3, 1, H), lambda v: (0, 0, 0)),        # b_ih
            pl.BlockSpec((3, 1, H), lambda v: (0, 0, 0)),        # b_hh
            pl.BlockSpec((H, H), lambda v: (0, 0)),              # w_cat (rnn half)
            pl.BlockSpec((H, H), lambda v: (0, 0)),              # w_cat (ctx half)
            pl.BlockSpec((1, H), lambda v: (0, 0)),              # b_cat
            pl.BlockSpec((H, tile_v), lambda v: (0, v)),         # w_out tile (streamed, double-buffered)
            pl.BlockSpec((1, V), lambda v: (0, 0)),              # b_out fully resident (no per-step DMA)
        ],
        out_specs=(
            pl.BlockSpec((B, V), lambda v: (0, 0)),              # probs (resident; logits accumulator)
            pl.BlockSpec((B, H), lambda v: (0, 0)),              # new hidden (resident, written step 0)
        ),
        scratch_shapes=[
            pltpu.VMEM((B, H), jnp.bfloat16),                    # cached concat_out
        ],
    )

    probs, h_new = pl.pallas_call(
        luong_decoder_kernel,
        out_shape=(jax.ShapeDtypeStruct((B, V), jnp.float32),
                   jax.ShapeDtypeStruct((B, H), jnp.float32)),
        grid_spec=grid_spec,
        compiler_params=pltpu.CompilerParams(
            # sequential dependency over the V axis (step-0 cache + last-step global softmax)
            dimension_semantics=("arbitrary",),
            vmem_limit_bytes=vmem_limit,
        ),
    )(x_emb, h_prev, enc,
      params['w_ih'], params['w_hh'], params['b_ih'], params['b_hh'],
      params['w_cat_rnn'], params['w_cat_ctx'], params['b_cat'],
      w_out_bf16, params['b_out'])

    return probs, h_new[None]                            # hidden as (1, B, H), like PyTorch


def init_params(key, hidden_size, output_size):
    ks = jax.random.split(key, 10)
    s = 0.1
    H, V = hidden_size, output_size
    return {
        'embedding': jax.random.normal(ks[0], (V, H), jnp.float32) * s,
        # GRU weights, pre-transposed, stacked per gate (r, z, n): y = x @ w[g] + b[g]
        'w_ih': jax.random.normal(ks[1], (3, H, H), jnp.float32) * s,
        'w_hh': jax.random.normal(ks[2], (3, H, H), jnp.float32) * s,
        'b_ih': jax.random.normal(ks[3], (3, 1, H), jnp.float32) * s,
        'b_hh': jax.random.normal(ks[4], (3, 1, H), jnp.float32) * s,
        # concat Linear (2H -> H), split into rnn-half and context-half
        'w_cat_rnn': jax.random.normal(ks[5], (H, H), jnp.float32) * s,
        'w_cat_ctx': jax.random.normal(ks[6], (H, H), jnp.float32) * s,
        'b_cat': jax.random.normal(ks[7], (1, H), jnp.float32) * s,
        # out Linear (H -> V)
        'w_out': jax.random.normal(ks[8], (H, V), jnp.float32) * s,
        'b_out': jax.random.normal(ks[9], (1, V), jnp.float32) * s,
    }


def _reference_forward(input_step, last_hidden, encoder_outputs, p):
    """Pure-JAX reference mirroring the PyTorch forward (sanity check)."""
    x = p['embedding'][input_step[0]]
    h = last_hidden[0]
    r = jax.nn.sigmoid(x @ p['w_ih'][0] + p['b_ih'][0] + h @ p['w_hh'][0] + p['b_hh'][0])
    z = jax.nn.sigmoid(x @ p['w_ih'][1] + p['b_ih'][1] + h @ p['w_hh'][1] + p['b_hh'][1])
    n = jnp.tanh(x @ p['w_ih'][2] + p['b_ih'][2] + r * (h @ p['w_hh'][2] + p['b_hh'][2]))
    h_new = (1.0 - z) * n + z * h
    scores = jnp.sum(h_new[None, :, :] * encoder_outputs, axis=2).T      # (B, L)
    attn = jax.nn.softmax(scores, axis=1)
    ctx = jnp.einsum('bl,lbh->bh', attn, encoder_outputs)
    co = jnp.tanh(h_new @ p['w_cat_rnn'] + ctx @ p['w_cat_ctx'] + p['b_cat'])
    out = jax.nn.softmax(co @ p['w_out'] + p['b_out'], axis=1)
    return out, h_new[None]


if __name__ == "__main__":
    # small but lane/sublane-aligned shapes: B multiple of 8, H and V multiples of 128
    B, H, L, V = 8, 128, 8, 1024   # batch, hiddenSize, encoder seq len, outputSize (vocab)
    key = jax.random.PRNGKey(0)
    kp, ki, kh, ke = jax.random.split(key, 4)

    params = init_params(kp, H, V)
    input_step = jax.random.randint(ki, (1, B), 0, V, dtype=jnp.int32)       # (1, B)
    last_hidden = jax.random.normal(kh, (1, B, H), jnp.float32)               # (1, B, H)
    encoder_outputs = jax.random.normal(ke, (L, B, H), jnp.float32)           # (L, B, H)

    ref_probs, ref_hidden = _reference_forward(input_step, last_hidden, encoder_outputs, params)

    # Exercise both paths: auto tile (fully VMEM-resident w_out, 1 grid step) and streamed tiles.
    for tv in (None, 256):
        probs, hidden = luong_attention_decoder_forward(
            input_step, last_hidden, encoder_outputs, params, tile_v=tv)
        probs = jax.block_until_ready(probs)
        hidden = jax.block_until_ready(hidden)

        assert probs.shape == (B, V) and hidden.shape == (1, B, H)
        # exact-division softmax -> rows sum to 1 within fp32 rounding
        assert jnp.allclose(jnp.sum(probs, axis=1), 1.0, atol=1e-3), \
            float(jnp.max(jnp.abs(jnp.sum(probs, axis=1) - 1.0)))
        assert jnp.allclose(hidden, ref_hidden, atol=2e-3, rtol=2e-3), \
            float(jnp.max(jnp.abs(hidden - ref_hidden)))
        # bf16 w_out + bf16 concat activations are the only low-precision pieces
        assert jnp.allclose(probs, ref_probs, atol=5e-3, rtol=0), \
            float(jnp.max(jnp.abs(probs - ref_probs)))

    print("KERNEL_OK")
</pallas_src>

<mosaic_0001>
module attributes {stable_mosaic.version = 11 : i64} {
  func.func @luong_decoder_kernel(%arg0: i32, %arg1: memref<8x128xf32, #tpu.memory_space<vmem>>, %arg2: memref<8x128xf32, #tpu.memory_space<vmem>>, %arg3: memref<8x8x128xf32, #tpu.memory_space<vmem>>, %arg4: memref<3x128x128xf32, #tpu.memory_space<vmem>>, %arg5: memref<3x128x128xf32, #tpu.memory_space<vmem>>, %arg6: memref<3x1x128xf32, #tpu.memory_space<vmem>>, %arg7: memref<3x1x128xf32, #tpu.memory_space<vmem>>, %arg8: memref<128x128xf32, #tpu.memory_space<vmem>>, %arg9: memref<128x128xf32, #tpu.memory_space<vmem>>, %arg10: memref<1x128xf32, #tpu.memory_space<vmem>>, %arg11: memref<128x1024xbf16, #tpu.memory_space<vmem>>, %arg12: memref<1x1024xf32, #tpu.memory_space<vmem>>, %arg13: memref<8x1024xf32, #tpu.memory_space<vmem>>, %arg14: memref<8x128xf32, #tpu.memory_space<vmem>>, %arg15: memref<8x128xbf16, #tpu.memory_space<vmem>>) attributes {dimension_semantics = [#tpu.dimension_semantics<arbitrary>], iteration_bounds = array<i64: 1>, scalar_prefetch = 0 : i64, scratch_operands = 1 : i64, tpu.core_type = #tpu.core_type<tc>, window_params = [{pipeline_mode = #tpu.pipeline_mode<synchronous>, transform_indices = @transform_0, window_bounds = array<i64: 8, 128>}, {pipeline_mode = #tpu.pipeline_mode<synchronous>, transform_indices = @transform_1, window_bounds = array<i64: 8, 128>}, {pipeline_mode = #tpu.pipeline_mode<synchronous>, transform_indices = @transform_2, window_bounds = array<i64: 8, 8, 128>}, {pipeline_mode = #tpu.pipeline_mode<synchronous>, transform_indices = @transform_3, window_bounds = array<i64: 3, 128, 128>}, {pipeline_mode = #tpu.pipeline_mode<synchronous>, transform_indices = @transform_4, window_bounds = array<i64: 3, 128, 128>}, {pipeline_mode = #tpu.pipeline_mode<synchronous>, transform_indices = @transform_5, window_bounds = array<i64: 3, 1, 128>}, {pipeline_mode = #tpu.pipeline_mode<synchronous>, transform_indices = @transform_6, window_bounds = array<i64: 3, 1, 128>}, {pipeline_mode = #tpu.pipeline_mode<synchronous>, transform_indices = @transform_7, window_bounds = array<i64: 128, 128>}, {pipeline_mode = #tpu.pipeline_mode<synchronous>, transform_indices = @transform_8, window_bounds = array<i64: 128, 128>}, {pipeline_mode = #tpu.pipeline_mode<synchronous>, transform_indices = @transform_9, window_bounds = array<i64: 1, 128>}, {transform_indices = @transform_10, window_bounds = array<i64: 128, 1024>}, {pipeline_mode = #tpu.pipeline_mode<synchronous>, transform_indices = @transform_11, window_bounds = array<i64: 1, 1024>}, {pipeline_mode = #tpu.pipeline_mode<synchronous>, transform_indices = @transform_12, window_bounds = array<i64: 8, 1024>}, {pipeline_mode = #tpu.pipeline_mode<synchronous>, transform_indices = @transform_13, window_bounds = array<i64: 8, 128>}]} {
    %c0_i32 = arith.constant 0 : i32
    %0 = arith.cmpi eq, %arg0, %c0_i32 : i32
    %1 = arith.extui %0 : i1 to i32
    %c0_i32_0 = arith.constant 0 : i32
    %2 = arith.cmpi ne, %1, %c0_i32_0 : i32
    scf.if %2 {
      %c0_7 = arith.constant 0 : index
      %c0_8 = arith.constant 0 : index
      %13 = vector.load %arg1[%c0_7, %c0_8] : memref<8x128xf32, #tpu.memory_space<vmem>>, vector<8x128xf32>
      %c0_9 = arith.constant 0 : index
      %c0_10 = arith.constant 0 : index
      %14 = vector.load %arg2[%c0_9, %c0_10] : memref<8x128xf32, #tpu.memory_space<vmem>>, vector<8x128xf32>
      %c0_11 = arith.constant 0 : index
      %c0_12 = arith.constant 0 : index
      %c0_13 = arith.constant 0 : index
      %15 = vector.load %arg4[%c0_11, %c0_12, %c0_13] : memref<3x128x128xf32, #tpu.memory_space<vmem>>, vector<1x128x128xf32>
      %16 = vector.shape_cast %15 : vector<1x128x128xf32> to vector<128x128xf32>
      %cst_14 = arith.constant dense<0.000000e+00> : vector<8x128xf32>
      %17 = tpu.matmul %13, %16, %cst_14 {dimension_numbers = #tpu.dot_dimension_numbers<[1], [0], [0], [1], [0, 0, 1, 1], [], []>} : vector<8x128xf32>, vector<128x128xf32>, vector<8x128xf32> -> vector<8x128xf32>
      %c0_15 = arith.constant 0 : index
      %c0_16 = arith.constant 0 : index
      %c0_17 = arith.constant 0 : index
      %18 = vector.load %arg6[%c0_15, %c0_16, %c0_17] : memref<3x1x128xf32, #tpu.memory_space<vmem>>, vector<1x1x128xf32>
      %19 = vector.shape_cast %18 : vector<1x1x128xf32> to vector<1x128xf32>
      %20 = vector.broadcast %19 : vector<1x128xf32> to vector<8x128xf32>
      %21 = arith.addf %17, %20 : vector<8x128xf32>
      %c0_18 = arith.constant 0 : index
      %c0_19 = arith.constant 0 : index
      %c0_20 = arith.constant 0 : index
      %22 = vector.load %arg5[%c0_18, %c0_19, %c0_20] : memref<3x128x128xf32, #tpu.memory_space<vmem>>, vector<1x128x128xf32>
      %23 = vector.shape_cast %22 : vector<1x128x128xf32> to vector<128x128xf32>
      %cst_21 = arith.constant dense<0.000000e+00> : vector<8x128xf32>
      %24 = tpu.matmul %14, %23, %cst_21 {dimension_numbers = #tpu.dot_dimension_numbers<[1], [0], [0], [1], [0, 0, 1, 1], [], []>} : vector<8x128xf32>, vector<128x128xf32>, vector<8x128xf32> -> vector<8x128xf32>
      %c0_22 = arith.constant 0 : index
      %c0_23 = arith.constant 0 : index
      %c0_24 = arith.constant 0 : index
      %25 = vector.load %arg7[%c0_22, %c0_23, %c0_24] : memref<3x1x128xf32, #tpu.memory_space<vmem>>, vector<1x1x128xf32>
      %26 = vector.shape_cast %25 : vector<1x1x128xf32> to vector<1x128xf32>
      %27 = vector.broadcast %26 : vector<1x128xf32> to vector<8x128xf32>
      %28 = arith.addf %24, %27 : vector<8x128xf32>
      %c1 = arith.constant 1 : index
      %c0_25 = arith.constant 0 : index
      %c0_26 = arith.constant 0 : index
      %29 = vector.load %arg4[%c1, %c0_25, %c0_26] : memref<3x128x128xf32, #tpu.memory_space<vmem>>, vector<1x128x128xf32>
      %30 = vector.shape_cast %29 : vector<1x128x128xf32> to vector<128x128xf32>
      %cst_27 = arith.constant dense<0.000000e+00> : vector<8x128xf32>
      %31 = tpu.matmul %13, %30, %cst_27 {dimension_numbers = #tpu.dot_dimension_numbers<[1], [0], [0], [1], [0, 0, 1, 1], [], []>} : vector<8x128xf32>, vector<128x128xf32>, vector<8x128xf32> -> vector<8x128xf32>
      %c1_28 = arith.constant 1 : index
      %c0_29 = arith.constant 0 : index
      %c0_30 = arith.constant 0 : index
      %32 = vector.load %arg6[%c1_28, %c0_29, %c0_30] : memref<3x1x128xf32, #tpu.memory_space<vmem>>, vector<1x1x128xf32>
      %33 = vector.shape_cast %32 : vector<1x1x128xf32> to vector<1x128xf32>
      %34 = vector.broadcast %33 : vector<1x128xf32> to vector<8x128xf32>
      %35 = arith.addf %31, %34 : vector<8x128xf32>
      %c1_31 = arith.constant 1 : index
      %c0_32 = arith.constant 0 : index
      %c0_33 = arith.constant 0 : index
      %36 = vector.load %arg5[%c1_31, %c0_32, %c0_33] : memref<3x128x128xf32, #tpu.memory_space<vmem>>, vector<1x128x128xf32>
      %37 = vector.shape_cast %36 : vector<1x128x128xf32> to vector<128x128xf32>
      %cst_34 = arith.constant dense<0.000000e+00> : vector<8x128xf32>
      %38 = tpu.matmul %14, %37, %cst_34 {dimension_numbers = #tpu.dot_dimension_numbers<[1], [0], [0], [1], [0, 0, 1, 1], [], []>} : vector<8x128xf32>, vector<128x128xf32>, vector<8x128xf32> -> vector<8x128xf32>
      %c1_35 = arith.constant 1 : index
      %c0_36 = arith.constant 0 : index
      %c0_37 = arith.constant 0 : index
      %39 = vector.load %arg7[%c1_35, %c0_36, %c0_37] : memref<3x1x128xf32, #tpu.memory_space<vmem>>, vector<1x1x128xf32>
      %40 = vector.shape_cast %39 : vector<1x1x128xf32> to vector<1x128xf32>
      %41 = vector.broadcast %40 : vector<1x128xf32> to vector<8x128xf32>
      %42 = arith.addf %38, %41 : vector<8x128xf32>
      %c2 = arith.constant 2 : index
      %c0_38 = arith.constant 0 : index
      %c0_39 = arith.constant 0 : index
      %43 = vector.load %arg4[%c2, %c0_38, %c0_39] : memref<3x128x128xf32, #tpu.memory_space<vmem>>, vector<1x128x128xf32>
      %44 = vector.shape_cast %43 : vector<1x128x128xf32> to vector<128x128xf32>
      %cst_40 = arith.constant dense<0.000000e+00> : vector<8x128xf32>
      %45 = tpu.matmul %13, %44, %cst_40 {dimension_numbers = #tpu.dot_dimension_numbers<[1], [0], [0], [1], [0, 0, 1, 1], [], []>} : vector<8x128xf32>, vector<128x128xf32>, vector<8x128xf32> -> vector<8x128xf32>
      %c2_41 = arith.constant 2 : index
      %c0_42 = arith.constant 0 : index
      %c0_43 = arith.constant 0 : index
      %46 = vector.load %arg6[%c2_41, %c0_42, %c0_43] : memref<3x1x128xf32, #tpu.memory_space<vmem>>, vector<1x1x128xf32>
      %47 = vector.shape_cast %46 : vector<1x1x128xf32> to vector<1x128xf32>
      %48 = vector.broadcast %47 : vector<1x128xf32> to vector<8x128xf32>
      %49 = arith.addf %45, %48 : vector<8x128xf32>
      %c2_44 = arith.constant 2 : index
      %c0_45 = arith.constant 0 : index
      %c0_46 = arith.constant 0 : index
      %50 = vector.load %arg5[%c2_44, %c0_45, %c0_46] : memref<3x128x128xf32, #tpu.memory_space<vmem>>, vector<1x128x128xf32>
      %51 = vector.shape_cast %50 : vector<1x128x128xf32> to vector<128x128xf32>
      %cst_47 = arith.constant dense<0.000000e+00> : vector<8x128xf32>
      %52 = tpu.matmul %14, %51, %cst_47 {dimension_numbers = #tpu.dot_dimension_numbers<[1], [0], [0], [1], [0, 0, 1, 1], [], []>} : vector<8x128xf32>, vector<128x128xf32>, vector<8x128xf32> -> vector<8x128xf32>
      %c2_48 = arith.constant 2 : index
      %c0_49 = arith.constant 0 : index
      %c0_50 = arith.constant 0 : index
      %53 = vector.load %arg7[%c2_48, %c0_49, %c0_50] : memref<3x1x128xf32, #tpu.memory_space<vmem>>, vector<1x1x128xf32>
      %54 = vector.shape_cast %53 : vector<1x1x128xf32> to vector<1x128xf32>
      %55 = vector.broadcast %54 : vector<1x128xf32> to vector<8x128xf32>
      %56 = arith.addf %52, %55 : vector<8x128xf32>
      %57 = arith.addf %21, %28 : vector<8x128xf32>
      %58 = arith.negf %57 : vector<8x128xf32>
      %59 = math.exp %58 : vector<8x128xf32>
      %cst_51 = arith.constant 1.000000e+00 : f32
      %60 = vector.broadcast %cst_51 : f32 to vector<8x128xf32>
      %61 = arith.addf %60, %59 : vector<8x128xf32>
      %62 = arith.divf %60, %61 : vector<8x128xf32>
      %63 = arith.addf %35, %42 : vector<8x128xf32>
      %64 = arith.negf %63 : vector<8x128xf32>
      %65 = math.exp %64 : vector<8x128xf32>
      %cst_52 = arith.constant 1.000000e+00 : f32
      %66 = vector.broadcast %cst_52 : f32 to vector<8x128xf32>
      %67 = arith.addf %66, %65 : vector<8x128xf32>
      %68 = arith.divf %66, %67 : vector<8x128xf32>
      %69 = arith.mulf %62, %56 : vector<8x128xf32>
      %70 = arith.addf %49, %69 : vector<8x128xf32>
      %71 = math.tanh %70 : vector<8x128xf32>
      %cst_53 = arith.constant 1.000000e+00 : f32
      %72 = vector.broadcast %cst_53 : f32 to vector<8x128xf32>
      %73 = arith.subf %72, %68 : vector<8x128xf32>
      %74 = arith.mulf %73, %71 : vector<8x128xf32>
      %75 = arith.mulf %68, %14 : vector<8x128xf32>
      %76 = arith.addf %74, %75 : vector<8x128xf32>
      %c0_54 = arith.constant 0 : index
      %c0_55 = arith.constant 0 : index
      %77 = vector.load %arg14[%c0_54, %c0_55] : memref<8x128xf32, #tpu.memory_space<vmem>>, vector<8x128xf32>
      tpu.vector_store %arg14[%c0_54, %c0_55], %76 {strides = array<i32>} : memref<8x128xf32, #tpu.memory_space<vmem>>, vector<8x128xf32>,
      %c0_56 = arith.constant 0 : index
      %c0_57 = arith.constant 0 : index
      %c0_58 = arith.constant 0 : index
      %78 = vector.load %arg3[%c0_56, %c0_57, %c0_58] : memref<8x8x128xf32, #tpu.memory_space<vmem>>, vector<8x8x128xf32>
      %79 = vector.shape_cast %76 : vector<8x128xf32> to vector<8x1x128xf32>
      "tpu.trace_start"() <{level = 10 : i32, message = "bqh,blh->bql"}> : () -> ()
      %cst_59 = arith.constant dense<0.000000e+00> : vector<8x1x8xf32>
      %80 = tpu.matmul %79, %78, %cst_59 {dimension_numbers = #tpu.dot_dimension_numbers<[2], [2], [1], [1], [0, 0, 0, 1, 1, 1], [0], [0]>} : vector<8x1x128xf32>, vector<8x8x128xf32>, vector<8x1x8xf32> -> vector<8x1x8xf32>
      "tpu.trace_stop"() : () -> ()
      %cst_60 = arith.constant dense<0xFF800000> : vector<8x1xf32>
      %81 = vector.multi_reduction <maximumf>, %80, %cst_60 [2] : vector<8x1x8xf32> to vector<8x1xf32>
      %82 = vector.shape_cast %81 : vector<8x1xf32> to vector<8x1x1xf32>
      %83 = vector.broadcast %82 : vector<8x1x1xf32> to vector<8x1x8xf32>
      %84 = arith.subf %80, %83 : vector<8x1x8xf32>
      %85 = math.exp %84 : vector<8x1x8xf32>
      %cst_61 = arith.constant dense<0.000000e+00> : vector<8x1xf32>
      %86 = vector.multi_reduction <add>, %85, %cst_61 [2] : vector<8x1x8xf32> to vector<8x1xf32>
      %87 = vector.shape_cast %86 : vector<8x1xf32> to vector<8x1x1xf32>
      %88 = vector.broadcast %87 : vector<8x1x1xf32> to vector<8x1x8xf32>
      %89 = arith.divf %85, %88 : vector<8x1x8xf32>
      "tpu.trace_start"() <{level = 10 : i32, message = "bql,blh->bqh"}> : () -> ()
      %cst_62 = arith.constant dense<0.000000e+00> : vector<8x1x128xf32>
      %90 = tpu.matmul %89, %78, %cst_62 {dimension_numbers = #tpu.dot_dimension_numbers<[2], [1], [1], [2], [0, 0, 0, 1, 1, 2], [0], [0]>} : vector<8x1x8xf32>, vector<8x8x128xf32>, vector<8x1x128xf32> -> vector<8x1x128xf32>
      "tpu.trace_stop"() : () -> ()
      %91 = vector.shape_cast %90 : vector<8x1x128xf32> to vector<8x128xf32>
      %c0_63 = arith.constant 0 : index
      %c0_64 = arith.constant 0 : index
      %92 = vector.load %arg8[%c0_63, %c0_64] : memref<128x128xf32, #tpu.memory_space<vmem>>, vector<128x128xf32>
      %cst_65 = arith.constant dense<0.000000e+00> : vector<8x128xf32>
      %93 = tpu.matmul %76, %92, %cst_65 {dimension_numbers = #tpu.dot_dimension_numbers<[1], [0], [0], [1], [0, 0, 1, 1], [], []>} : vector<8x128xf32>, vector<128x128xf32>, vector<8x128xf32> -> vector<8x128xf32>
      %c0_66 = arith.constant 0 : index
      %c0_67 = arith.constant 0 : index
      %94 = vector.load %arg9[%c0_66, %c0_67] : memref<128x128xf32, #tpu.memory_space<vmem>>, vector<128x128xf32>
      %cst_68 = arith.constant dense<0.000000e+00> : vector<8x128xf32>
      %95 = tpu.matmul %91, %94, %cst_68 {dimension_numbers = #tpu.dot_dimension_numbers<[1], [0], [0], [1], [0, 0, 1, 1], [], []>} : vector<8x128xf32>, vector<128x128xf32>, vector<8x128xf32> -> vector<8x128xf32>
      %96 = arith.addf %93, %95 : vector<8x128xf32>
      %c0_69 = arith.constant 0 : index
      %c0_70 = arith.constant 0 : index
      %97 = vector.load %arg10[%c0_69, %c0_70] : memref<1x128xf32, #tpu.memory_space<vmem>>, vector<1x128xf32>
      %98 = vector.broadcast %97 : vector<1x128xf32> to vector<8x128xf32>
      %99 = arith.addf %96, %98 : vector<8x128xf32>
      %100 = math.tanh %99 : vector<8x128xf32>
      %101 = arith.truncf %100 : vector<8x128xf32> to vector<8x128xbf16>
      %c0_71 = arith.constant 0 : index
      %c0_72 = arith.constant 0 : index
      %102 = vector.load %arg15[%c0_71, %c0_72] : memref<8x128xbf16, #tpu.memory_space<vmem>>, vector<8x128xbf16>
      tpu.vector_store %arg15[%c0_71, %c0_72], %101 {strides = array<i32>} : memref<8x128xbf16, #tpu.memory_space<vmem>>, vector<8x128xbf16>,
    } else {
    }
    %c0 = arith.constant 0 : index
    %c0_1 = arith.constant 0 : index
    %3 = vector.load %arg15[%c0, %c0_1] : memref<8x128xbf16, #tpu.memory_space<vmem>>, vector<8x128xbf16>
    %c0_2 = arith.constant 0 : index
    %c0_3 = arith.constant 0 : index
    %4 = vector.load %arg11[%c0_2, %c0_3] : memref<128x1024xbf16, #tpu.memory_space<vmem>>, vector<128x1024xbf16>
    %cst = arith.constant dense<0.000000e+00> : vector<8x1024xf32>
    %5 = tpu.matmul %3, %4, %cst {dimension_numbers = #tpu.dot_dimension_numbers<[1], [0], [0], [1], [0, 0, 1, 1], [], []>} : vector<8x128xbf16>, vector<128x1024xbf16>, vector<8x1024xf32> -> vector<8x1024xf32>
    %c1024_i32 = arith.constant 1024 : i32
    %6 = arith.muli %arg0, %c1024_i32 : i32
    %7 = tpu.assume_multiple %6, 1024 : i32
    %c0_4 = arith.constant 0 : index
    %8 = arith.index_cast %7 : i32 to index
    %9 = vector.load %arg13[%c0_4, %8] : memref<8x1024xf32, #tpu.memory_space<vmem>>, vector<8x1024xf32>
    tpu.vector_store %arg13[%c0_4, %8], %5 {strides = array<i32>} : memref<8x1024xf32, #tpu.memory_space<vmem>>, vector<8x1024xf32>,
    %c0_i32_5 = arith.constant 0 : i32
    %10 = arith.cmpi eq, %arg0, %c0_i32_5 : i32
    %11 = arith.extui %10 : i1 to i32
    %c0_i32_6 = arith.constant 0 : i32
    %12 = arith.cmpi ne, %11, %c0_i32_6 : i32
    scf.if %12 {
      %c0_7 = arith.constant 0 : index
      %c0_8 = arith.constant 0 : index
      %13 = vector.load %arg13[%c0_7, %c0_8] : memref<8x1024xf32, #tpu.memory_space<vmem>>, vector<8x1024xf32>
      %c0_9 = arith.constant 0 : index
      %c0_10 = arith.constant 0 : index
      %14 = vector.load %arg12[%c0_9, %c0_10] : memref<1x1024xf32, #tpu.memory_space<vmem>>, vector<1x1024xf32>
      %15 = vector.broadcast %14 : vector<1x1024xf32> to vector<8x1024xf32>
      %16 = arith.addf %13, %15 : vector<8x1024xf32>
      %cst_11 = arith.constant dense<0xFF800000> : vector<8xf32>
      %17 = vector.multi_reduction <maximumf>, %16, %cst_11 [1] : vector<8x1024xf32> to vector<8xf32>
      %18 = vector.shape_cast %17 : vector<8xf32> to vector<8x1xf32>
      %19 = vector.broadcast %18 : vector<8x1xf32> to vector<8x1024xf32>
      %20 = arith.subf %16, %19 : vector<8x1024xf32>
      %21 = math.exp %20 : vector<8x1024xf32>
      %cst_12 = arith.constant dense<0.000000e+00> : vector<8xf32>
      %22 = vector.multi_reduction <add>, %21, %cst_12 [1] : vector<8x1024xf32> to vector<8xf32>
      %23 = vector.shape_cast %22 : vector<8xf32> to vector<8x1xf32>
      %24 = vector.broadcast %23 : vector<8x1xf32> to vector<8x1024xf32>
      %25 = arith.divf %21, %24 : vector<8x1024xf32>
      %c0_13 = arith.constant 0 : index
      %c0_14 = arith.constant 0 : index
      %26 = vector.load %arg13[%c0_13, %c0_14] : memref<8x1024xf32, #tpu.memory_space<vmem>>, vector<8x1024xf32>
      tpu.vector_store %arg13[%c0_13, %c0_14], %25 {strides = array<i32>} : memref<8x1024xf32, #tpu.memory_space<vmem>>, vector<8x1024xf32>,
    } else {
    }
    return
  }
  func.func @transform_0(%arg0: i32) -> (i32, i32) {
    %c0_i32 = arith.constant 0 : i32
    %c0_i32_0 = arith.constant 0 : i32
    %c0_i32_1 = arith.constant 0 : i32
    return %c0_i32, %c0_i32_0 : i32, i32
  }
  func.func @transform_1(%arg0: i32) -> (i32, i32) {
    %c0_i32 = arith.constant 0 : i32
    %c0_i32_0 = arith.constant 0 : i32
    %c0_i32_1 = arith.constant 0 : i32
    return %c0_i32, %c0_i32_0 : i32, i32
  }
  func.func @transform_2(%arg0: i32) -> (i32, i32, i32) {
    %c0_i32 = arith.constant 0 : i32
    %c0_i32_0 = arith.constant 0 : i32
    %c0_i32_1 = arith.constant 0 : i32
    %c0_i32_2 = arith.constant 0 : i32
    return %c0_i32, %c0_i32_0, %c0_i32_1 : i32, i32, i32
  }
  func.func @transform_3(%arg0: i32) -> (i32, i32, i32) {
    %c0_i32 = arith.constant 0 : i32
    %c0_i32_0 = arith.constant 0 : i32
    %c0_i32_1 = arith.constant 0 : i32
    %c0_i32_2 = arith.constant 0 : i32
    return %c0_i32, %c0_i32_0, %c0_i32_1 : i32, i32, i32
  }
  func.func @transform_4(%arg0: i32) -> (i32, i32, i32) {
    %c0_i32 = arith.constant 0 : i32
    %c0_i32_0 = arith.constant 0 : i32
    %c0_i32_1 = arith.constant 0 : i32
    %c0_i32_2 = arith.constant 0 : i32
    return %c0_i32, %c0_i32_0, %c0_i32_1 : i32, i32, i32
  }
  func.func @transform_5(%arg0: i32) -> (i32, i32, i32) {
    %c0_i32 = arith.constant 0 : i32
    %c0_i32_0 = arith.constant 0 : i32
    %c0_i32_1 = arith.constant 0 : i32
    %c0_i32_2 = arith.constant 0 : i32
    return %c0_i32, %c0_i32_0, %c0_i32_1 : i32, i32, i32
  }
  func.func @transform_6(%arg0: i32) -> (i32, i32, i32) {
    %c0_i32 = arith.constant 0 : i32
    %c0_i32_0 = arith.constant 0 : i32
    %c0_i32_1 = arith.constant 0 : i32
    %c0_i32_2 = arith.constant 0 : i32
    return %c0_i32, %c0_i32_0, %c0_i32_1 : i32, i32, i32
  }
  func.func @transform_7(%arg0: i32) -> (i32, i32) {
    %c0_i32 = arith.constant 0 : i32
    %c0_i32_0 = arith.constant 0 : i32
    %c0_i32_1 = arith.constant 0 : i32
    return %c0_i32, %c0_i32_0 : i32, i32
  }
  func.func @transform_8(%arg0: i32) -> (i32, i32) {
    %c0_i32 = arith.constant 0 : i32
    %c0_i32_0 = arith.constant 0 : i32
    %c0_i32_1 = arith.constant 0 : i32
    return %c0_i32, %c0_i32_0 : i32, i32
  }
  func.func @transform_9(%arg0: i32) -> (i32, i32) {
    %c0_i32 = arith.constant 0 : i32
    %c0_i32_0 = arith.constant 0 : i32
    %c0_i32_1 = arith.constant 0 : i32
    return %c0_i32, %c0_i32_0 : i32, i32
  }
  func.func @transform_10(%arg0: i32) -> (i32, i32) {
    %c0_i32 = arith.constant 0 : i32
    %c0_i32_0 = arith.constant 0 : i32
    return %c0_i32, %arg0 : i32, i32
  }
  func.func @transform_11(%arg0: i32) -> (i32, i32) {
    %c0_i32 = arith.constant 0 : i32
    %c0_i32_0 = arith.constant 0 : i32
    %c0_i32_1 = arith.constant 0 : i32
    return %c0_i32, %c0_i32_0 : i32, i32
  }
  func.func @transform_12(%arg0: i32) -> (i32, i32) {
    %c0_i32 = arith.constant 0 : i32
    %c0_i32_0 = arith.constant 0 : i32
    %c0_i32_1 = arith.constant 0 : i32
    return %c0_i32, %c0_i32_0 : i32, i32
  }
  func.func @transform_13(%arg0: i32) -> (i32, i32) {
    %c0_i32 = arith.constant 0 : i32
    %c0_i32_0 = arith.constant 0 : i32
    %c0_i32_1 = arith.constant 0 : i32
    return %c0_i32, %c0_i32_0 : i32, i32
  }
}

</mosaic_0001>

<bundles_post_ra>
// kernel: tpu_custom_call.1
= control target key start
LH: loop header
LB: loop body
LE: loop exit
PB: predicated region body
PF: predicated region fallthrough
CT: control target
= control target key end

     0   :  { %19 = vsyncpa [#allocation4], 0  ;;  %s4577_s0 = inlined_call_operand.hbm [shape: f32[8,128], index: 0, kind: input, shape index: {}]   ;;  %s4578_s1 = inlined_call_operand.hbm [shape: f32[8,128], index: 1, kind: input, shape index: {}]   ;;  %s4579_s2 = inlined_call_operand.hbm [shape: f32[8,8,128], index: 2, kind: input, shape index: {}]   ;;  %s4580_s3 = inlined_call_operand.hbm [shape: f32[3,128,128], index: 3, kind: input, shape index: {}]   ;;  %s4581_s4 = inlined_call_operand.hbm [shape: f32[3,128,128], index: 4, kind: input, shape index: {}]   ;;  %s4582_s5 = inlined_call_operand.vmem [shape: f32[3,1,128], index: 5, kind: input, shape index: {}]   ;;  %s4583_s6 = inlined_call_operand.vmem [shape: f32[3,1,128], index: 6, kind: input, shape index: {}]   ;;  %s4584_s7 = inlined_call_operand.hbm [shape: f32[128,128], index: 7, kind: input, shape index: {}]   ;;  %s4585_s8 = inlined_call_operand.hbm [shape: f32[128,128], index: 8, kind: input, shape index: {}]   ;;  %s4586_s9 = inlined_call_operand.vmem [shape: f32[1,128], index: 9, kind: input, shape index: {}]   ;;  %s4587_s10 = inlined_call_operand.hbm [shape: bf16[128,1024], index: 10, kind: input, shape index: {}]   ;;  %s4588_s11 = inlined_call_operand.vmem [shape: f32[1,1024], index: 11, kind: input, shape index: {}]   ;;  %s4589_s12 = inlined_call_operand.hbm [shape: f32[8,1024], index: 12, kind: output, shape index: {0}]   ;;  %s4590_s13 = inlined_call_operand.hbm [shape: f32[8,128], index: 13, kind: output, shape index: {1}]  }
   0x1   :  { %20 = vsyncpa [#allocation7], 0 }
   0x2   :  { %21 = vsyncpa [#allocation10], 0 }
   0x3   :  { %22 = vsyncpa [#allocation13], 0 }
   0x4   :  { %23 = vsyncpa [#allocation16], 0 }
   0x5   :  { %24 = vsyncpa [#allocation5], 0 }
   0x6   :  { %25 = vsyncpa [#allocation19], 0  ;;  %s4103_s25 = smov [#allocation6]   ;;  %s3869_s29 = scalar_lea.hbm %s4578_s1, 128 }
   0x7   :  { %s42_s26 = sshll.u32 %s4103_s25, 4  ;;  %p3870_p0 = scmp.ne.s32.totalorder %s4578_s1, %s3869_s29  ;;  %s43_s26 = int_to_ptr.vmem [resolvable:$true] %s42_s26 }
   0x8   :  { %p3873_p1 = scmp.lt.u32.totalorder %s3869_s29, %s4578_s1 }
   0xa   :  { %p3875_p2 = pnand %p3873_p1, %p3870_p0 }
   0xc   :  { %3878 = shalt.err (!%p3875_p2)
}
   0xd   :  { %s3879_s17 = scalar_lea.vmem %s43_s26, 128  ;;  %p3884_p4 = scmp.lt.s32.totalorder %s43_s26, %s43_s26 }
   0xe   :  { %p3880_p3 = scmp.ne.s32.totalorder %s43_s26, %s3879_s17  ;;  %p3885_p5 = scmp.lt.s32.totalorder %s3879_s17, %s3879_s17 }
  0x10   :  { %p3886_p6 = por %p3885_p5, %p3884_p4 }
  0x12   :  { %p3887_p7 = pnand %p3886_p6, %p3880_p3 }
  0x14   :  { %3890 = shalt.err (!%p3887_p7)
}
  0x15   :  { %45 = dma.hbm_to_vmem [thread:$0]  %s4578_s1, 128, %s43_s26, [#allocation7]  }
  0x16   :  { %s4104_s20 = smov [#allocation9]   ;;  %s4105_s22 = smov [#allocation12]  }
  0x17   :  { %s63_s21 = sshll.u32 %s4104_s20, 4  ;;  %s91_s23 = sshll.u32 %s4105_s22, 4  ;;  %s64_s21 = int_to_ptr.vmem [resolvable:$true] %s63_s21  ;;  %s92_s23 = int_to_ptr.vmem [resolvable:$true] %s91_s23 }
  0x18   :  { %s3891_s27 = scalar_lea.hbm %s4580_s3, 6144 }
  0x19   :  { %p3892_p8 = scmp.ne.s32.totalorder %s4580_s3, %s3891_s27  ;;  %p3895_p9 = scmp.lt.u32.totalorder %s3891_s27, %s4580_s3 }
  0x1b   :  { %p3897_p10 = pnand %p3895_p9, %p3892_p8 }
  0x1d   :  { %3900 = shalt.err (!%p3897_p10)
}
  0x1e   :  { %s3901_s1 = scalar_lea.vmem %s64_s21, 6144  ;;  %p3906_p12 = scmp.lt.s32.totalorder %s64_s21, %s64_s21 }
  0x1f   :  { %p3902_p11 = scmp.ne.s32.totalorder %s64_s21, %s3901_s1  ;;  %p3907_p13 = scmp.lt.s32.totalorder %s3901_s1, %s3901_s1 }
  0x21   :  { %p3908_p0 = por %p3907_p13, %p3906_p12 }
  0x23   :  { %p3909_p1 = pnand %p3908_p0, %p3902_p11 }
  0x25   :  { %3912 = shalt.err (!%p3909_p1)
}
  0x26   :  { %s4106_s26 = smov 128   ;;  %s4107_s15 = smov 8  }
  0x27   :  { %69 = dma.hbm_to_vmem [thread:$0]  %s4580_s3, 6144, %s64_s21, [#allocation10], %s4106_s26, %s4106_s26, %s4107_s15  }
  0x28   :  { %s3913_s20 = scalar_lea.hbm %s4584_s7, 2048 }
  0x29   :  { %p3914_p2 = scmp.ne.s32.totalorder %s4584_s7, %s3913_s20  ;;  %p3917_p3 = scmp.lt.u32.totalorder %s3913_s20, %s4584_s7 }
  0x2b   :  { %p3919_p4 = pnand %p3917_p3, %p3914_p2 }
  0x2d   :  { %3922 = shalt.err (!%p3919_p4)
}
  0x2e   :  { %s3923_s28 = scalar_lea.vmem %s92_s23, 2048  ;;  %p3928_p6 = scmp.lt.s32.totalorder %s92_s23, %s92_s23 }
  0x2f   :  { %p3924_p5 = scmp.ne.s32.totalorder %s92_s23, %s3923_s28  ;;  %p3929_p7 = scmp.lt.s32.totalorder %s3923_s28, %s3923_s28 }
  0x31   :  { %p3930_p8 = por %p3929_p7, %p3928_p6 }
  0x33   :  { %p3931_p9 = pnand %p3930_p8, %p3924_p5 }
  0x35   :  { %3934 = shalt.err (!%p3931_p9)
}
  0x36   :  { %97 = dma.hbm_to_vmem [thread:$0]  %s4584_s7, 2048, %s92_s23, [#allocation13], %s4106_s26, %s4106_s26, %s4107_s15  }
  0x37   :  { %s4108_s29 = smov [#allocation3]   ;;  %s4109_s14 = smov [#allocation8]  }
  0x38   :  { %s32_s30 = sshll.u32 %s4108_s29, 4  ;;  %s51_s1 = sshll.u32 %s4109_s14, 4  ;;  %s33_s30 = int_to_ptr.vmem [resolvable:$true] %s32_s30  ;;  %s52_s1 = int_to_ptr.vmem [resolvable:$true] %s51_s1 }
  0x39   :  { %s3935_s18 = scalar_lea.hbm %s4577_s0, 128 }
  0x3a   :  { %p3936_p10 = scmp.ne.s32.totalorder %s4577_s0, %s3935_s18  ;;  %p3939_p11 = scmp.lt.u32.totalorder %s3935_s18, %s4577_s0 }
  0x3c   :  { %p3941_p12 = pnand %p3939_p11, %p3936_p10 }
  0x3e   :  { %3944 = shalt.err (!%p3941_p12)
}
  0x3f   :  { %s3945_s7 = scalar_lea.vmem %s33_s30, 128  ;;  %p3950_p0 = scmp.lt.s32.totalorder %s33_s30, %s33_s30 }
  0x40   :  { %p3946_p13 = scmp.ne.s32.totalorder %s33_s30, %s3945_s7  ;;  %p3951_p1 = scmp.lt.s32.totalorder %s3945_s7, %s3945_s7 }
  0x42   :  { %p3952_p2 = por %p3951_p1, %p3950_p0 }
  0x44   :  { %p3953_p3 = pnand %p3952_p2, %p3946_p13 }
  0x46   :  { %3956 = shalt.err (!%p3953_p3)
}
  0x47   :  { %35 = dma.hbm_to_vmem [thread:$0]  %s4577_s0, 128, %s33_s30, [#allocation4]  }
  0x48   :  { %s3957_s3 = scalar_lea.hbm %s4579_s2, 1024 }
  0x49   :  { %p3958_p4 = scmp.ne.s32.totalorder %s4579_s2, %s3957_s3  ;;  %p3961_p5 = scmp.lt.u32.totalorder %s3957_s3, %s4579_s2 }
  0x4b   :  { %p3963_p6 = pnand %p3961_p5, %p3958_p4 }
  0x4d   :  { %3966 = shalt.err (!%p3963_p6)
}
  0x4e   :  { %s3967_s17 = scalar_lea.vmem %s52_s1, 1024  ;;  %p3972_p8 = scmp.lt.s32.totalorder %s52_s1, %s52_s1 }
  0x4f   :  { %p3968_p7 = scmp.ne.s32.totalorder %s52_s1, %s3967_s17  ;;  %p3973_p9 = scmp.lt.s32.totalorder %s3967_s17, %s3967_s17 }
  0x51   :  { %p3974_p10 = por %p3973_p9, %p3972_p8 }
  0x53   :  { %p3975_p11 = pnand %p3974_p10, %p3968_p7 }
  0x55   :  { %3978 = shalt.err (!%p3975_p11)
}
  0x56   :  { %57 = dma.hbm_to_vmem [thread:$0]  %s4579_s2, 1024, %s52_s1, [#allocation7], %s4106_s26, %s4106_s26, %s4107_s15  }
  0x57   :  { %s4110_s18 = smov [#allocation11]   ;;  %s4111_s20 = smov [#allocation14]  }
  0x58   :  { %s75_s19 = sshll.u32 %s4110_s18, 4  ;;  %s103_s22 = sshll.u32 %s4111_s20, 4  ;;  %s76_s19 = int_to_ptr.vmem [resolvable:$true] %s75_s19  ;;  %s104_s22 = int_to_ptr.vmem [resolvable:$true] %s103_s22 }
  0x59   :  { %s3979_s23 = scalar_lea.hbm %s4581_s4, 6144 }
  0x5a   :  { %p3980_p12 = scmp.ne.s32.totalorder %s4581_s4, %s3979_s23  ;;  %p3983_p13 = scmp.lt.u32.totalorder %s3979_s23, %s4581_s4 }
  0x5c   :  { %p3985_p0 = pnand %p3983_p13, %p3980_p12 }
  0x5e   :  { %3988 = shalt.err (!%p3985_p0)
}
  0x5f   :  { %s3989_s2 = scalar_lea.vmem %s76_s19, 6144  ;;  %p3994_p2 = scmp.lt.s32.totalorder %s76_s19, %s76_s19 }
  0x60   :  { %p3990_p1 = scmp.ne.s32.totalorder %s76_s19, %s3989_s2  ;;  %p3995_p3 = scmp.lt.s32.totalorder %s3989_s2, %s3989_s2 }
  0x62   :  { %p3996_p4 = por %p3995_p3, %p3994_p2 }
  0x64   :  { %p3997_p5 = pnand %p3996_p4, %p3990_p1 }
  0x66   :  { %4000 = shalt.err (!%p3997_p5)
}
  0x67   :  { %81 = dma.hbm_to_vmem [thread:$0]  %s4581_s4, 6144, %s76_s19, [#allocation10], %s4106_s26, %s4106_s26, %s4107_s15  }
  0x68   :  { %s4001_s16 = scalar_lea.hbm %s4585_s8, 2048 }
  0x69   :  { %p4002_p6 = scmp.ne.s32.totalorder %s4585_s8, %s4001_s16  ;;  %p4005_p7 = scmp.lt.u32.totalorder %s4001_s16, %s4585_s8 }
  0x6b   :  { %p4007_p8 = pnand %p4005_p7, %p4002_p6 }
  0x6d   :  { %4010 = shalt.err (!%p4007_p8)
}
  0x6e   :  { %s4011_s20 = scalar_lea.vmem %s104_s22, 2048  ;;  %p4016_p10 = scmp.lt.s32.totalorder %s104_s22, %s104_s22 }
  0x6f   :  { %p4012_p9 = scmp.ne.s32.totalorder %s104_s22, %s4011_s20  ;;  %p4017_p11 = scmp.lt.s32.totalorder %s4011_s20, %s4011_s20 }
  0x71   :  { %p4018_p12 = por %p4017_p11, %p4016_p10 }
  0x73   :  { %p4019_p13 = pnand %p4018_p12, %p4012_p9 }
  0x75   :  { %4022 = shalt.err (!%p4019_p13)
}
  0x76   :  { %109 = dma.hbm_to_vmem [thread:$0]  %s4585_s8, 2048, %s104_s22, [#allocation13], %s4106_s26, %s4106_s26, %s4107_s15  }
  0x77   :  { %s4112_s24 = smov [#allocation15]   ;;  %s4023_s27 = scalar_lea.hbm %s4587_s10, 8192 }
  0x78   :  { %s117_s7 = sshll.u32 %s4112_s24, 4  ;;  %p4024_p0 = scmp.ne.s32.totalorder %s4587_s10, %s4023_s27  ;;  %s118_s7 = int_to_ptr.vmem [resolvable:$true] %s117_s7 }
  0x79   :  { %p4027_p1 = scmp.lt.u32.totalorder %s4023_s27, %s4587_s10 }
  0x7b   :  { %p4029_p2 = pnand %p4027_p1, %p4024_p0 }
  0x7d   :  { %4032 = shalt.err (!%p4029_p2)
}
  0x7e   :  { %s4033_s21 = scalar_lea.vmem %s118_s7, 8192  ;;  %p4038_p4 = scmp.lt.s32.totalorder %s118_s7, %s118_s7 }
  0x7f   :  { %p4034_p3 = scmp.ne.s32.totalorder %s118_s7, %s4033_s21  ;;  %p4039_p5 = scmp.lt.s32.totalorder %s4033_s21, %s4033_s21 }
  0x81   :  { %p4040_p6 = por %p4039_p5, %p4038_p4 }
  0x83   :  { %p4041_p7 = pnand %p4040_p6, %p4034_p3 }
  0x85   :  { %4044 = shalt.err (!%p4041_p7)
}
  0x86   :  { %s4113_s8 = smov 512   ;;  %s4114_s26 = smov 32  }
  0x87   :  { %123 = dma.hbm_to_vmem [thread:$0]  %s4587_s10, 8192, %s118_s7, [#allocation16], %s4113_s8, %s4113_s8, %s4114_s26  }
  0x88   :  { %4089 = dma.done.wait [#allocation4], 128  }
  0x89   :  { %4090 = vsyncadd [#allocation4], 4294967168 }
  0x8a   :  { %4091 = dma.done.wait [#allocation7], 1152  }
  0x8b   :  { %4092 = vsyncadd [#allocation7], 4294966144 }
  0x8c   :  { %4093 = dma.done.wait [#allocation10], 12288  }
  0x8d   :  { %4094 = vsyncadd [#allocation10], 4294955008 }
  0x8e   :  { %4095 = dma.done.wait [#allocation13], 4096  }
  0x8f   :  { %4096 = vsyncadd [#allocation13], 4294963200 }
  0x90   :  { %4097 = dma.done.wait [#allocation16], 8192  }
  0x91   :  { %4098 = vsyncadd [#allocation16], 4294959104  ;;  %v4115_v0 = vmov 0.0|0.0   ;;  %vm4116_vm0 = vmmov 0   ;;  %v4117_v1 = vmov 0.0   ;;  %v157_v2 = vld [vmem:[#allocation9] sm:$0xff] }
  0x92   :  { %3588 = vmatprep.subr.bf16.mxu0 %v4115_v0  ;;  %3636 = vmatprep.subr.bf16.mxu1 %v4115_v0  ;;  %v158_v3 = vld [vmem:[#allocation9 + $0x8] sm:$0xff]  ;;  %v344_v4 = vld [vmem:[#allocation9 + $0x80] sm:$0xff]  ;;  %v159_v7 = vld [vmem:[#allocation9 + $0x10] sm:$0xff]  ;;  %vm1371_vm1 = vcmask 57344   ;;  %vm1460_vm2 = vcmask 64512   ;;  %vm2086_vm3 = vcmask 1041409  }
  0x93   :  { %3260 = vmatprep.mubr.msk.f32.mxu0 %vm4116_vm0, %v4117_v1  ;;  %3330 = vmatprep.mubr.msk.f32.mxu1 %vm4116_vm0, %v4117_v1  ;;  %v3589_v5 = vpack.c.bf16 %v158_v3, %v157_v2  ;;  %v345_v6 = vld [vmem:[#allocation9 + $0x88] sm:$0xff]  ;;  %v160_v8 = vld [vmem:[#allocation9 + $0x18] sm:$0xff]  ;;  %v346_v10 = vld [vmem:[#allocation9 + $0x90] sm:$0xff]  ;;  %vm2089_vm4 = vcmask 1042434   ;;  %vm2092_vm5 = vcmask 1043459   ;;  %vm2095_vm6 = vcmask 1044484  }
  0x94   :  { %v3637_v9 = vpack.c.bf16 %v345_v6, %v344_v4  ;;  %v347_v11 = vld [vmem:[#allocation9 + $0x98] sm:$0xff]  ;;  %v3592_v12 = vpack.c.bf16 %v160_v8, %v159_v7  ;;  %v161_v14 = vld [vmem:[#allocation9 + $0x20] sm:$0xff]  ;;  %v162_v15 = vld [vmem:[#allocation9 + $0x28] sm:$0xff]  ;;  %vm2098_vm7 = vcmask 1045509   ;;  %vm2101_vm8 = vcmask 1046534  }
  0x95   :  { %3590 = vmatpush3.bf16.msra.mxu0 %v3589_v5  ;;  %v3640_v13 = vpack.c.bf16 %v347_v11, %v346_v10  ;;  %v348_v16 = vld [vmem:[#allocation9 + $0xa0] sm:$0xff]  ;;  %v349_v17 = vld [vmem:[#allocation9 + $0xa8] sm:$0xff]  ;;  %v3595_v18 = vpack.c.bf16 %v162_v15, %v161_v14  ;;  %v163_v20 = vld [vmem:[#allocation9 + $0x30] sm:$0xff]  ;;  %vm2104_vm9 = vcmask 1047559  }
  0x96   :  { %3638 = vmatpush3.bf16.msra.mxu1 %v3637_v9  ;;  %3591 = vmatprep.subr.bf16.mxu0 %v4115_v0  ;;  %v3643_v19 = vpack.c.bf16 %v349_v17, %v348_v16  ;;  %v164_v21 = vld [vmem:[#allocation9 + $0x38] sm:$0xff]  ;;  %v350_v22 = vld [vmem:[#allocation9 + $0xb0] sm:$0xff]  ;;  %v165_v26 = vld [vmem:[#allocation9 + $0x40] sm:$0xff] }
  0x97   :  { %3639 = vmatprep.subr.bf16.mxu1 %v4115_v0  ;;  %v351_v23 = vld [vmem:[#allocation9 + $0xb8] sm:$0xff]  ;;  %v3598_v24 = vpack.c.bf16 %v164_v21, %v163_v20  ;;  %v166_v27 = vld [vmem:[#allocation9 + $0x48] sm:$0xff]  ;;  %v352_v28 = vld [vmem:[#allocation9 + $0xc0] sm:$0xff] }
  0x98   :  { %v3646_v25 = vpack.c.bf16 %v351_v23, %v350_v22  ;;  %v353_v29 = vld [vmem:[#allocation9 + $0xc8] sm:$0xff]  ;;  %v3601_v30 = vpack.c.bf16 %v166_v27, %v165_v26  ;;  %v167_v32 = vld [vmem:[#allocation9 + $0x50] sm:$0xff]  ;;  %v168_v33 = vld [vmem:[#allocation9 + $0x58] sm:$0xff] }
  0x99   :  { %3593 = vmatpush3.bf16.msra.mxu0 %v3592_v12  ;;  %v3649_v31 = vpack.c.bf16 %v353_v29, %v352_v28  ;;  %v354_v34 = vld [vmem:[#allocation9 + $0xd0] sm:$0xff]  ;;  %v355_v35 = vld [vmem:[#allocation9 + $0xd8] sm:$0xff]  ;;  %v3604_v36 = vpack.c.bf16 %v168_v33, %v167_v32  ;;  %v169_v38 = vld [vmem:[#allocation9 + $0x60] sm:$0xff] }
  0x9a   :  { %3641 = vmatpush3.bf16.msra.mxu1 %v3640_v13  ;;  %3594 = vmatprep.subr.bf16.mxu0 %v4115_v0  ;;  %v3652_v37 = vpack.c.bf16 %v355_v35, %v354_v34  ;;  %v170_v39 = vld [vmem:[#allocation9 + $0x68] sm:$0xff]  ;;  %v356_v40 = vld [vmem:[#allocation9 + $0xe0] sm:$0xff]  ;;  %v171_v44 = vld [vmem:[#allocation9 + $0x70] sm:$0xff] }
  0x9b   :  { %3642 = vmatprep.subr.bf16.mxu1 %v4115_v0  ;;  %v357_v41 = vld [vmem:[#allocation9 + $0xe8] sm:$0xff]  ;;  %v3607_v42 = vpack.c.bf16 %v170_v39, %v169_v38  ;;  %v172_v45 = vld [vmem:[#allocation9 + $0x78] sm:$0xff]  ;;  %v358_v46 = vld [vmem:[#allocation9 + $0xf0] sm:$0xff] }
  0x9c   :  { %v3655_v43 = vpack.c.bf16 %v357_v41, %v356_v40  ;;  %v359_v47 = vld [vmem:[#allocation9 + $0xf8] sm:$0xff]  ;;  %v3610_v48 = vpack.c.bf16 %v172_v45, %v171_v44  ;;  %v250_v50 = vld [vmem:[#allocation11] sm:$0xff]  ;;  %v251_v51 = vld [vmem:[#allocation11 + $0x8] sm:$0xff] }
  0x9d   :  { %3596 = vmatpush3.bf16.msra.mxu0 %v3595_v18  ;;  %v3658_v49 = vpack.c.bf16 %v359_v47, %v358_v46  ;;  %v439_v52 = vld [vmem:[#allocation11 + $0x80] sm:$0xff]  ;;  %v440_v53 = vld [vmem:[#allocation11 + $0x88] sm:$0xff]  ;;  %v4323_v54 = vld [vmem:[#allocation3] sm:$0xff]  ;;  %v3613_v55 = vpack.c.bf16 %v251_v51, %v250_v50 }
  0x9e   :  { %3644 = vmatpush3.bf16.msra.mxu1 %v3643_v19  ;;  %3597 = vmatprep.subr.bf16.mxu0 %v4115_v0  ;;  %v3661_v56 = vpack.c.bf16 %v440_v53, %v439_v52  ;;  %v252_v57 = vld [vmem:[#allocation11 + $0x10] sm:$0xff]  ;;  %v253_v58 = vld [vmem:[#allocation11 + $0x18] sm:$0xff]  ;;  %v254_v63 = vld [vmem:[#allocation11 + $0x20] sm:$0xff] }
  0x9f   :  { %3645 = vmatprep.subr.bf16.mxu1 %v4115_v0  ;;  %v441_v59 = vld [vmem:[#allocation11 + $0x90] sm:$0xff]  ;;  %v442_v60 = vld [vmem:[#allocation11 + $0x98] sm:$0xff]  ;;  %v3616_v61 = vpack.c.bf16 %v253_v58, %v252_v57  ;;  %v255_v2 = vld [vmem:[#allocation11 + $0x28] sm:$0xff] }
  0xa0   :  { %v3664_v62 = vpack.c.bf16 %v442_v60, %v441_v59  ;;  %v443_v3 = vld [vmem:[#allocation11 + $0xa0] sm:$0xff]  ;;  %v444_v4 = vld [vmem:[#allocation11 + $0xa8] sm:$0xff]  ;;  %v3619_v5 = vpack.c.bf16 %v255_v2, %v254_v63  ;;  %v256_v7 = vld [vmem:[#allocation11 + $0x30] sm:$0xff] }
  0xa1   :  { %3599 = vmatpush3.bf16.msra.mxu0 %v3598_v24  ;;  %v3667_v6 = vpack.c.bf16 %v444_v4, %v443_v3  ;;  %v257_v8 = vld [vmem:[#allocation11 + $0x38] sm:$0xff]  ;;  %v445_v9 = vld [vmem:[#allocation11 + $0xb0] sm:$0xff]  ;;  %v258_v13 = vld [vmem:[#allocation11 + $0x40] sm:$0xff] }
  0xa2   :  { %3647 = vmatpush3.bf16.msra.mxu1 %v3646_v25  ;;  %3600 = vmatprep.subr.bf16.mxu0 %v4115_v0  ;;  %v446_v10 = vld [vmem:[#allocation11 + $0xb8] sm:$0xff]  ;;  %v3622_v11 = vpack.c.bf16 %v257_v8, %v256_v7  ;;  %v259_v14 = vld [vmem:[#allocation11 + $0x48] sm:$0xff]  ;;  %v447_v15 = vld [vmem:[#allocation11 + $0xc0] sm:$0xff] }
  0xa3   :  { %3648 = vmatprep.subr.bf16.mxu1 %v4115_v0  ;;  %v3670_v12 = vpack.c.bf16 %v446_v10, %v445_v9  ;;  %v448_v16 = vld [vmem:[#allocation11 + $0xc8] sm:$0xff]  ;;  %v3625_v17 = vpack.c.bf16 %v259_v14, %v258_v13  ;;  %v260_v19 = vld [vmem:[#allocation11 + $0x50] sm:$0xff]  ;;  %v261_v20 = vld [vmem:[#allocation11 + $0x58] sm:$0xff] }
  0xa4   :  { %v3673_v18 = vpack.c.bf16 %v448_v16, %v447_v15  ;;  %v449_v21 = vld [vmem:[#allocation11 + $0xd0] sm:$0xff]  ;;  %v450_v22 = vld [vmem:[#allocation11 + $0xd8] sm:$0xff]  ;;  %v3628_v23 = vpack.c.bf16 %v261_v20, %v260_v19  ;;  %v262_v25 = vld [vmem:[#allocation11 + $0x60] sm:$0xff] }
  0xa5   :  { %3602 = vmatpush3.bf16.msra.mxu0 %v3601_v30  ;;  %v3676_v24 = vpack.c.bf16 %v450_v22, %v449_v21  ;;  %v263_v26 = vld [vmem:[#allocation11 + $0x68] sm:$0xff]  ;;  %v451_v27 = vld [vmem:[#allocation11 + $0xe0] sm:$0xff]  ;;  %v265_v32 = vld [vmem:[#allocation11 + $0x78] sm:$0xff] }
  0xa6   :  { %3650 = vmatpush3.bf16.msra.mxu1 %v3649_v31  ;;  %3603 = vmatprep.subr.bf16.mxu0 %v4115_v0  ;;  %v452_v28 = vld [vmem:[#allocation11 + $0xe8] sm:$0xff]  ;;  %v3631_v29 = vpack.c.bf16 %v263_v26, %v262_v25  ;;  %v264_v31 = vld [vmem:[#allocation11 + $0x70] sm:$0xff]  ;;  %v454_v34 = vld [vmem:[#allocation11 + $0xf8] sm:$0xff] }
  0xa7   :  { %3651 = vmatprep.subr.bf16.mxu1 %v4115_v0  ;;  %v3679_v30 = vpack.c.bf16 %v452_v28, %v451_v27  ;;  %v453_v33 = vld [vmem:[#allocation11 + $0xf0] sm:$0xff]  ;;  %v3634_v35 = vpack.c.bf16 %v265_v32, %v264_v31  ;;  %v535_v38 = vld [vmem:[#allocation9 + $0x108] sm:$0xff]  ;;  %v629_v39 = vld [vmem:[#allocation11 + $0x100] sm:$0xff] }
  0xa8   :  { %v630_v40 = vld [vmem:[#allocation11 + $0x108] sm:$0xff]  ;;  %v4347_v41 = vld [vmem:[#allocation6] sm:$0xff]  ;;  %v536_v44 = vld [vmem:[#allocation9 + $0x110] sm:$0xff] }
  0xa9   :  { %3605 = vmatpush3.bf16.msra.mxu0 %v3604_v36  ;;  %v3682_v36 = vpack.c.bf16 %v454_v34, %v453_v33  ;;  %v537_v45 = vld [vmem:[#allocation9 + $0x118] sm:$0xff]  ;;  %v631_v46 = vld [vmem:[#allocation11 + $0x110] sm:$0xff]  ;;  %v538_v50 = vld [vmem:[#allocation9 + $0x120] sm:$0xff] }
  0xaa   :  { %3653 = vmatpush3.bf16.msra.mxu1 %v3652_v37  ;;  %3606 = vmatprep.subr.bf16.mxu0 %v4115_v0  ;;  %v534_v37 = vld [vmem:[#allocation9 + $0x100] sm:$0xff]  ;;  %v632_v47 = vld [vmem:[#allocation11 + $0x118] sm:$0xff]  ;;  %v539_v51 = vld [vmem:[#allocation9 + $0x128] sm:$0xff] }
  0xab   :  { %3654 = vmatprep.subr.bf16.mxu1 %v4115_v0  ;;  %v633_v52 = vld [vmem:[#allocation11 + $0x120] sm:$0xff]  ;;  %v634_v53 = vld [vmem:[#allocation11 + $0x128] sm:$0xff]  ;;  %v540_v57 = vld [vmem:[#allocation9 + $0x130] sm:$0xff] }
  0xac   :  { %v541_v58 = vld [vmem:[#allocation9 + $0x138] sm:$0xff]  ;;  %v635_v59 = vld [vmem:[#allocation11 + $0x130] sm:$0xff]  ;;  %v542_v63 = vld [vmem:[#allocation9 + $0x140] sm:$0xff] }
  0xad   :  { %3608 = vmatpush3.bf16.msra.mxu0 %v3607_v42  ;;  %v3685_v42 = vpack.c.bf16 %v535_v38, %v534_v37  ;;  %v636_v60 = vld [vmem:[#allocation11 + $0x138] sm:$0xff]  ;;  %v543_v2 = vld [vmem:[#allocation9 + $0x148] sm:$0xff]  ;;  %v637_v3 = vld [vmem:[#allocation11 + $0x140] sm:$0xff] }
  0xae   :  { %3656 = vmatpush3.bf16.msra.mxu1 %v3655_v43  ;;  %3609 = vmatprep.subr.bf16.mxu0 %v4115_v0  ;;  %v3709_v43 = vpack.c.bf16 %v630_v40, %v629_v39  ;;  %v638_v4 = vld [vmem:[#allocation11 + $0x148] sm:$0xff]  ;;  %v544_v7 = vld [vmem:[#allocation9 + $0x150] sm:$0xff]  ;;  %v545_v8 = vld [vmem:[#allocation9 + $0x158] sm:$0xff] }
  0xaf   :  { %3657 = vmatprep.subr.bf16.mxu1 %v4115_v0  ;;  %v639_v9 = vld [vmem:[#allocation11 + $0x150] sm:$0xff]  ;;  %v640_v10 = vld [vmem:[#allocation11 + $0x158] sm:$0xff]  ;;  %v546_v13 = vld [vmem:[#allocation9 + $0x160] sm:$0xff] }
  0xb0   :  { %v547_v14 = vld [vmem:[#allocation9 + $0x168] sm:$0xff]  ;;  %v641_v15 = vld [vmem:[#allocation11 + $0x160] sm:$0xff]  ;;  %v548_v19 = vld [vmem:[#allocation9 + $0x170] sm:$0xff] }
  0xb1   :  { %3611 = vmatpush3.bf16.msra.mxu0 %v3610_v48  ;;  %v3688_v48 = vpack.c.bf16 %v537_v45, %v536_v44  ;;  %v642_v16 = vld [vmem:[#allocation11 + $0x168] sm:$0xff]  ;;  %v549_v20 = vld [vmem:[#allocation9 + $0x178] sm:$0xff]  ;;  %v643_v21 = vld [vmem:[#allocation11 + $0x170] sm:$0xff] }
  0xb2   :  { %3659 = vmatpush3.bf16.msra.mxu1 %v3658_v49  ;;  %3612 = vmatprep.subr.bf16.mxu0 %v4115_v0  ;;  %v3712_v49 = vpack.c.bf16 %v632_v47, %v631_v46  ;;  %v644_v22 = vld [vmem:[#allocation11 + $0x178] sm:$0xff]  ;;  %v4379_v25 = vld [vmem:[#allocation8] sm:$0xff]  ;;  %v4381_v26 = vld [vmem:[#allocation8 + $0x8] sm:$0xff] }
  0xb3   :  { %3660 = vmatprep.subr.bf16.mxu1 %v4115_v0  ;;  %v2976_v27 = vld [vmem:[%s4583_s6] ss:$0 sm:$0xff]  ;;  %v2984_v44 = vld [vmem:[%s4583_s6 + $0x2] ss:$0 sm:$0xff] }
  0xb4   :  { %3261 = vmatmul.mubr.f32.vlgmr.msra.gmra.mrb[0].mxu0 %v4323_v54  ;;  %v2982_v45 = vld [vmem:[%s4582_s5 + $0x2] ss:$0 sm:$0xff] }
  0xb5   :  { %3614 = vmatpush3.bf16.msra.mxu0 %v3613_v55  ;;  %3331 = vmatmul.mubr.f32.vlgmr.msra.gmra.mrb[0].mxu1 %v4323_v54  ;;  %v3691_v55 = vpack.c.bf16 %v539_v51, %v538_v50 }
  0xb6   :  { %3662 = vmatpush3.bf16.msra.mxu1 %v3661_v56  ;;  %3615 = vmatprep.subr.bf16.mxu0 %v4115_v0  ;;  %v3715_v56 = vpack.c.bf16 %v634_v53, %v633_v52 }
  0xb7   :  { %3663 = vmatprep.subr.bf16.mxu1 %v4115_v0  ;;  %3295 = vmatprep.mubr.msk.f32.mxu0 %vm4116_vm0, %v4117_v1 }
  0xb8   :  { %3365 = vmatprep.mubr.msk.f32.mxu1 %vm4116_vm0, %v4117_v1 }
  0xb9   :  { %3617 = vmatpush3.bf16.msra.mxu0 %v3616_v61  ;;  %v3694_v61 = vpack.c.bf16 %v541_v58, %v540_v57  ;;  %v4118_v57 = vmov 1966171168  }
  0xba   :  { %3665 = vmatpush3.bf16.msra.mxu1 %v3664_v62  ;;  %3618 = vmatprep.subr.bf16.mxu0 %v4115_v0  ;;  %v3718_v62 = vpack.c.bf16 %v636_v60, %v635_v59  ;;  %v756_v58 = vunpack.c.l.s4 %v4118_v57  ;;  %v758_v59 = vlaneseq }
  0xbb   :  { %3666 = vmatprep.subr.bf16.mxu1 %v4115_v0 }
  0xbd   :  { %3620 = vmatpush3.bf16.msra.mxu0 %v3619_v5  ;;  %v3697_v5 = vpack.c.bf16 %v543_v2, %v542_v63 }
  0xbe   :  { %3668 = vmatpush3.bf16.msra.mxu1 %v3667_v6  ;;  %3621 = vmatprep.subr.bf16.mxu0 %v4115_v0  ;;  %v3721_v6 = vpack.c.bf16 %v638_v4, %v637_v3 }
  0xbf   :  { %3669 = vmatprep.subr.bf16.mxu1 %v4115_v0 }
  0xc1   :  { %3623 = vmatpush3.bf16.msra.mxu0 %v3622_v11  ;;  %v3700_v11 = vpack.c.bf16 %v545_v8, %v544_v7 }
  0xc2   :  { %3671 = vmatpush3.bf16.msra.mxu1 %v3670_v12  ;;  %3624 = vmatprep.subr.bf16.mxu0 %v4115_v0  ;;  %v3724_v12 = vpack.c.bf16 %v640_v10, %v639_v9  ;;  %v4415_v10 = vld [vmem:[#allocation8 + $0x10] sm:$0xff] }
  0xc3   :  { %3672 = vmatprep.subr.bf16.mxu1 %v4115_v0 }
  0xc5   :  { %3626 = vmatpush3.bf16.msra.mxu0 %v3625_v17  ;;  %v3703_v17 = vpack.c.bf16 %v547_v14, %v546_v13  ;;  %v4417_v13 = vld [vmem:[#allocation8 + $0x18] sm:$0xff] }
  0xc6   :  { %3674 = vmatpush3.bf16.msra.mxu1 %v3673_v18  ;;  %3627 = vmatprep.subr.bf16.mxu0 %v4115_v0  ;;  %v3727_v18 = vpack.c.bf16 %v642_v16, %v641_v15  ;;  %v4423_v15 = vld [vmem:[#allocation8 + $0x20] sm:$0xff] }
  0xc7   :  { %3675 = vmatprep.subr.bf16.mxu1 %v4115_v0 }
  0xc9   :  { %3629 = vmatpush3.bf16.msra.mxu0 %v3628_v23  ;;  %v3706_v23 = vpack.c.bf16 %v549_v20, %v548_v19  ;;  %v4435_v20 = vld [vmem:[#allocation8 + $0x30] sm:$0xff] }
  0xca   :  { %3677 = vmatpush3.bf16.msra.mxu1 %v3676_v24  ;;  %3630 = vmatprep.subr.bf16.mxu0 %v4115_v0  ;;  %v3730_v24 = vpack.c.bf16 %v644_v22, %v643_v21  ;;  %v4441_v22 = vld [vmem:[#allocation8 + $0x38] sm:$0xff] }
  0xcb   :  { %3678 = vmatprep.subr.bf16.mxu1 %v4115_v0 }
  0xcd   :  { %3632 = vmatpush3.bf16.msra.mxu0 %v3631_v29 }
  0xce   :  { %3680 = vmatpush3.bf16.msra.mxu1 %v3679_v30  ;;  %3633 = vmatprep.subr.bf16.mxu0 %v4115_v0 }
  0xcf   :  { %3681 = vmatprep.subr.bf16.mxu1 %v4115_v0 }
  0xd1   :  { %3635 = vmatpush3.bf16.msra.mxu0 %v3634_v35  ;;  %v2978_v35 = vld [vmem:[%s4582_s5 + $0x1] ss:$0 sm:$0xff] }
  0xd2   :  { %3683 = vmatpush3.bf16.msra.mxu1 %v3682_v36  ;;  %3684 = vmatprep.subr.bf16.mxu0 %v4115_v0  ;;  %v2980_v36 = vld [vmem:[%s4583_s6 + $0x1] ss:$0 sm:$0xff] }
  0xd3   :  { %3708 = vmatprep.subr.bf16.mxu1 %v4115_v0  ;;  %v3782_v37 = vadd.f32 %v2980_v36, %v2978_v35 }
  0xd4   :  { %3296 = vmatmul.mubr.f32.vlgmr.msra.gmra.mrb[0].mxu0 %v4347_v41 }
  0xd5   :  { %3366 = vmatmul.mubr.f32.vlgmr.msra.gmra.mrb[0].mxu1 %v4347_v41  ;;  %3686 = vmatpush3.bf16.msra.mxu0 %v3685_v42 }
  0xd6   :  { %3710 = vmatpush3.bf16.msra.mxu1 %v3709_v43  ;;  %3687 = vmatprep.subr.bf16.mxu0 %v4115_v0 }
  0xd7   :  { %3711 = vmatprep.subr.bf16.mxu1 %v4115_v0  ;;  %3435 = vmatprep.mubr.msk.f32.mxu1 %vm4116_vm0, %v4117_v1 }
  0xd8   :  { %3400 = vmatprep.mubr.msk.f32.mxu0 %vm4116_vm0, %v4117_v1 }
  0xd9   :  { %3689 = vmatpush3.bf16.msra.mxu0 %v3688_v48 }
  0xda   :  { %3713 = vmatpush3.bf16.msra.mxu1 %v3712_v49  ;;  %3690 = vmatprep.subr.bf16.mxu0 %v4115_v0 }
  0xdb   :  { %3714 = vmatprep.subr.bf16.mxu1 %v4115_v0 }
  0xdd   :  { %3692 = vmatpush3.bf16.msra.mxu0 %v3691_v55 }
  0xde   :  { %3716 = vmatpush3.bf16.msra.mxu1 %v3715_v56  ;;  %3693 = vmatprep.subr.bf16.mxu0 %v4115_v0 }
  0xdf   :  { %3717 = vmatprep.subr.bf16.mxu1 %v4115_v0 }
  0xe1   :  { %3695 = vmatpush3.bf16.msra.mxu0 %v3694_v61  ;;  %v757_v61 = vunpack.c.0.s8 %v756_v58 }
  0xe2   :  { %3719 = vmatpush3.bf16.msra.mxu1 %v3718_v62  ;;  %3696 = vmatprep.subr.bf16.mxu0 %v4115_v0  ;;  %v4405_v62 = vshrl.u32 %v758_v59, 7 }
  0xe3   :  { %3720 = vmatprep.subr.bf16.mxu1 %v4115_v0 }
  0xe5   :  { %3698 = vmatpush3.bf16.msra.mxu0 %v3697_v5  ;;  %v760_v5 = vsub.s32 %v757_v61, %v4405_v62 }
  0xe6   :  { %3722 = vmatpush3.bf16.msra.mxu1 %v3721_v6  ;;  %3699 = vmatprep.subr.bf16.mxu0 %v4115_v0 }
  0xe7   :  { %3723 = vmatprep.subr.bf16.mxu1 %v4115_v0 }
  0xe9   :  { %3701 = vmatpush3.bf16.msra.mxu0 %v3700_v11 }
  0xea   :  { %3725 = vmatpush3.bf16.msra.mxu1 %v3724_v12  ;;  %3702 = vmatprep.subr.bf16.mxu0 %v4115_v0 }
  0xeb   :  { %3726 = vmatprep.subr.bf16.mxu1 %v4115_v0 }
  0xed   :  { %3704 = vmatpush3.bf16.msra.mxu0 %v3703_v17  ;;  %v4429_v17 = vld [vmem:[#allocation8 + $0x28] sm:$0xff] }
  0xee   :  { %3728 = vmatpush3.bf16.msra.mxu1 %v3727_v18  ;;  %3705 = vmatprep.subr.bf16.mxu0 %v4115_v0 }
  0xef   :  { %3729 = vmatprep.subr.bf16.mxu1 %v4115_v0 }
  0xf1   :  { %3707 = vmatpush3.bf16.msra.mxu0 %v3706_v23 }
  0xf2   :  { %3731 = vmatpush3.bf16.msra.mxu1 %v3730_v24  ;;  %3438 = vmatprep.subr.mxu0 %v4117_v1 }
  0xf3   :  { %3443 = vmatprep.subr.mxu1 %v4117_v1 }
  0xf4   :  { %3401 = vmatmul.mubr.f32.vlgmr.msra.gmra.mrb[2].mxu0 %v4323_v54  ;;  %v2975_v54 = vld [vmem:[%s4582_s5] ss:$0 sm:$0xff] }
  0xf5   :  { %3436 = vmatmul.mubr.f32.vlgmr.msra.gmra.mrb[2].mxu1 %v4347_v41  ;;  %3440 = vmatprep.mubr.msk.f32.mxu0 %vm4116_vm0, %v4117_v1  ;;  %v3780_v28 = vadd.f32 %v2976_v27, %v2975_v54 }
  0xf6   :  { %3445 = vmatprep.mubr.msk.f32.mxu1 %vm4116_vm0, %v4117_v1 }
  0xfa   :  { %3439 = vmatpush3.xpose.msra.mxu0 %v4379_v25 }
  0xfb   :  { %3444 = vmatpush3.xpose.msra.mxu1 %v4381_v26  ;;  %3448 = vmatprep.subr.mxu0 %v4117_v1 }
  0xfc   :  { %3453 = vmatprep.subr.mxu1 %v4117_v1 }
 0x1a7   :  { %v339_v29 = vpop.f32.mrb[0].mxu0 }
 0x1a8   :  { %v3781_v30 = vadd.f32 %v3780_v28, %v339_v29  ;;  %v529_v31 = vpop.f32.mrb[0].mxu1  ;;  %v3297_v32 = vpop.f32.mrb[1].mxu0 }
 0x1a9   :  { %v3367_v33 = vpop.f32.mrb[1].mxu1  ;;  %v3783_v38 = vadd.f32 %v3782_v37, %v529_v31 }
 0x1aa   :  { %v2985_v34 = vmul.f32 -1.442695, %v3781_v30 }
 0x1ab   :  { %v2986_v39 = vmul.f32 -1.442695, %v3783_v38 }
 0x1ac   :  { %3807 = vpow2.f32 %v2985_v34 }
 0x1ad   :  { %3809 = vpow2.f32 %v2986_v39 }
 0x1b6   :  { %v3808_v40 = vpop.eup %3807 }
 0x1b7   :  { %v727_v42 = vadd.f32 1.0, %v3808_v40  ;;  %v3810_v43 = vpop.eup %3809 }
 0x1b8   :  { %v734_v46 = vadd.f32 1.0, %v3810_v43 }
 0x1b9   :  { %3811 = vrcp.f32 %v727_v42 }
 0x1ba   :  { %3813 = vrcp.f32 %v734_v46 }
 0x1c3   :  { %v3812_v53 = vpop.eup %3811 }
 0x1c4   :  { %v3814_v60 = vpop.eup %3813 }
 0x1c5   :  { %v740_v63 = vsub.f32 1.0, %v3814_v60  ;;  %v742_v3 = vmul.f32 %v3814_v60, %v4347_v41 }
 0x1c7   :  { %v624_v47 = vpop.f32.mrb[2].mxu0 }
 0x1c8   :  { %v719_v48 = vpop.f32.mrb[2].mxu1  ;;  %v3402_v49 = vpop.f32.mrb[3].mxu0  ;;  %v625_v51 = vadd.f32 %v2982_v45, %v624_v47 }
 0x1c9   :  { %v720_v50 = vadd.f32 %v2984_v44, %v719_v48  ;;  %v3437_v52 = vpop.f32.mrb[3].mxu1 }
 0x1cb   :  { %v737_v55 = vmul.f32 %v3812_v53, %v720_v50 }
 0x1cd   :  { %v738_v56 = vadd.f32 %v737_v55, %v625_v51 }
 0x1cf   :  { %3815 = vtanh.f32 %v738_v56 }
 0x1d9   :  { %v3816_v2 = vpop.eup %3815 }
 0x1da   :  { %v741_v4 = vmul.f32 %v3816_v2, %v740_v63 }
 0x1dc   :  { %v4409_v6 = vadd.f32 %v742_v3, %v741_v4 }
 0x1de   :  { %744 = vst [vmem:[#allocation18] sm:$0xff] %v4409_v6  ;;  %v761_v7 = vrot.slane %v4409_v6, %v760_v5  ;;  %v754_v8 = vcombine.high %v4409_v6, %v4409_v6 }
 0x1e0   :  { %v777_v9 = vrot.slane %v761_v7, %v760_v5  ;;  %v769_v11 = vcombine.high %v761_v7, %v761_v7  ;;  %v768_v41 = vrot.slane %v754_v8, %v760_v5 }
 0x1e2   :  { %3441 = vmatmul.mubr.f32.vlgmr.msra.gmra.mrb[4].mxu0 %v777_v9  ;;  %v791_v12 = vrot.slane %v769_v11, %v760_v5  ;;  %v799_v14 = vcombine.high %v777_v9, %v777_v9  ;;  %v770_v18 = vcombine.high %v768_v41, %v768_v41  ;;  %v784_v19 = vrot.slane %v768_v41, %v760_v5 }
 0x1e3   :  { %3449 = vmatpush3.xpose.msra.mxu0 %v4415_v10  ;;  %3450 = vmatprep.mubr.msk.f32.mxu0 %vm4116_vm0, %v4117_v1 }
 0x1e4   :  { %3446 = vmatmul.mubr.f32.vlgmr.msra.gmra.mrb[4].mxu1 %v791_v12  ;;  %3458 = vmatprep.subr.mxu0 %v4117_v1  ;;  %v801_v16 = vcombine.high %v791_v12, %v791_v12  ;;  %v798_v21 = vrot.slane %v770_v18, %v760_v5  ;;  %v800_v23 = vcombine.high %v784_v19, %v784_v19 }
 0x1e5   :  { %3454 = vmatpush3.xpose.msra.mxu1 %v4417_v13  ;;  %3455 = vmatprep.mubr.msk.f32.mxu1 %vm4116_vm0, %v4117_v1 }
 0x1e6   :  { %3451 = vmatmul.mubr.f32.vlgmr.msra.gmra.mrb[6].mxu0 %v799_v14  ;;  %3463 = vmatprep.subr.mxu1 %v4117_v1  ;;  %v802_v24 = vcombine.high %v798_v21, %v798_v21 }
 0x1e7   :  { %3459 = vmatpush3.xpose.msra.mxu0 %v4423_v15  ;;  %3460 = vmatprep.mubr.msk.f32.mxu0 %vm4116_vm0, %v4117_v1 }
 0x1e8   :  { %3456 = vmatmul.mubr.f32.vlgmr.msra.gmra.mrb[6].mxu1 %v801_v16  ;;  %3468 = vmatprep.subr.mxu0 %v4117_v1 }
 0x1e9   :  { %3464 = vmatpush3.xpose.msra.mxu1 %v4429_v17  ;;  %3465 = vmatprep.mubr.msk.f32.mxu1 %vm4116_vm0, %v4117_v1 }
 0x1ea   :  { %3461 = vmatmul.mubr.f32.vlgmr.msra.gmra.mrb[8].mxu0 %v784_v19  ;;  %3473 = vmatprep.subr.mxu1 %v4117_v1 }
 0x1eb   :  { %3469 = vmatpush3.xpose.msra.mxu0 %v4435_v20  ;;  %3470 = vmatprep.mubr.msk.f32.mxu0 %vm4116_vm0, %v4117_v1 }
 0x1ec   :  { %3466 = vmatmul.mubr.f32.vlgmr.msra.gmra.mrb[8].mxu1 %v798_v21  ;;  %3478 = vmatprep.subr.mxu0 %v4117_v1 }
 0x1ed   :  { %3474 = vmatpush3.xpose.msra.mxu1 %v4441_v22  ;;  %3475 = vmatprep.mubr.msk.f32.mxu1 %vm4116_vm0, %v4117_v1 }
 0x1ee   :  { %3471 = vmatmul.mubr.f32.vlgmr.msra.gmra.mrb[10].mxu0 %v800_v23  ;;  %3483 = vmatprep.subr.mxu1 %v4117_v1 }
 0x1ef   :  { %3479 = vmatpush3.msra.mxu0 %v4379_v25  ;;  %3480 = vmatprep.mubr.msk.f32.mxu0 %vm4116_vm0, %v4117_v1 }
 0x1f0   :  { %3476 = vmatmul.mubr.f32.vlgmr.msra.gmra.mrb[10].mxu1 %v802_v24  ;;  %3488 = vmatprep.subr.mxu0 %v4117_v1 }
 0x1f1   :  { %3484 = vmatpush3.msra.mxu1 %v4381_v26  ;;  %3485 = vmatprep.mubr.msk.f32.mxu1 %vm4116_vm0, %v4117_v1 }
 0x1f2   :  { %3493 = vmatprep.subr.mxu1 %v4117_v1 }
 0x2b5   :  { %v877_v54 = vpop.f32.mrb[4].mxu0 }
 0x2b6   :  { %v3442_v27 = vpop.f32.mrb[5].mxu0  ;;  %v1372_v28 = vsel %vm1371_vm1, %v877_v54, -inf }
 0x2b7   :  { %v947_v29 = vpop.f32.mrb[4].mxu1  ;;  %1373 = vmax.xlane.f32.xlu0 %v1372_v28 }
 0x2b8   :  { %v3447_v25 = vpop.f32.mrb[5].mxu1  ;;  %v1375_v32 = vsel %vm1371_vm1, %v947_v29, -inf }
 0x2b9   :  { %v1017_v30 = vpop.f32.mrb[6].mxu0 }
 0x2ba   :  { %v3452_v31 = vpop.f32.mrb[7].mxu0  ;;  %v1378_v33 = vsel %vm1371_vm1, %v1017_v30, -inf }
 0x2bb   :  { %v1087_v26 = vpop.f32.mrb[6].mxu1  ;;  %1376 = vmax.xlane.f32.xlu0 %v1375_v32  ;;  %1379 = vmax.xlane.f32.xlu1 %v1378_v33 }
 0x2bc   :  { %v3457_v34 = vpop.f32.mrb[7].mxu1  ;;  %v1381_v37 = vsel %vm1371_vm1, %v1087_v26, -inf }
 0x2bd   :  { %v1157_v35 = vpop.f32.mrb[8].mxu0 }
 0x2be   :  { %v3462_v36 = vpop.f32.mrb[9].mxu0  ;;  %v1384_v38 = vsel %vm1371_vm1, %v1157_v35, -inf }
 0x2bf   :  { %v1227_v39 = vpop.f32.mrb[8].mxu1  ;;  %1382 = vmax.xlane.f32.xlu1 %v1381_v37  ;;  %1385 = vmax.xlane.f32.xlu0 %v1384_v38 }
 0x2c0   :  { %v3467_v40 = vpop.f32.mrb[9].mxu1  ;;  %v1387_v44 = vsel %vm1371_vm1, %v1227_v39, -inf }
 0x2c1   :  { %v1297_v42 = vpop.f32.mrb[10].mxu0 }
 0x2c2   :  { %v3472_v43 = vpop.f32.mrb[11].mxu0  ;;  %v1390_v45 = vsel %vm1371_vm1, %v1297_v42, -inf }
 0x2c3   :  { %v1367_v46 = vpop.f32.mrb[10].mxu1  ;;  %1388 = vmax.xlane.f32.xlu1 %v1387_v44  ;;  %1391 = vmax.xlane.f32.xlu0 %v1390_v45 }
 0x2c4   :  { %v3477_v47 = vpop.f32.mrb[11].mxu1  ;;  %v1393_v48 = vsel %vm1371_vm1, %v1367_v46, -inf }
 0x2c7   :  { %1394 = vmax.xlane.f32.xlu1 %v1393_v48 }
 0x344   :  { %v1374_v49 = vpop.xlane.xlu0 %1373 }
 0x345   :  { %v1396_v50 = vsub.f32 %v877_v54, %v1374_v49 }
 0x347   :  { %v1404_v51 = vmul.f32 1.442695, %v1396_v50 }
 0x348   :  { %v1377_v52 = vpop.xlane.xlu0 %1376  ;;  %v1380_v53 = vpop.xlane.xlu1 %1379 }
 0x349   :  { %3817 = vpow2.f32 %v1404_v51  ;;  %v1397_v55 = vsub.f32 %v947_v29, %v1377_v52  ;;  %v1398_v56 = vsub.f32 %v1017_v30, %v1380_v53  ;;  %v2061_v52 = vld [vmem:[#allocation14] sm:$0xff]  ;;  %v2062_v53 = vld [vmem:[#allocation14 + $0x8] sm:$0xff] }
 0x34b   :  { %v1406_v57 = vmul.f32 1.442695, %v1397_v55  ;;  %v1408_v58 = vmul.f32 1.442695, %v1398_v56 }
 0x34c   :  { %v1383_v59 = vpop.xlane.xlu1 %1382  ;;  %v1386_v60 = vpop.xlane.xlu0 %1385 }
 0x34d   :  { %3819 = vpow2.f32 %v1406_v57  ;;  %v1399_v61 = vsub.f32 %v1087_v26, %v1383_v59  ;;  %v1400_v63 = vsub.f32 %v1157_v35, %v1386_v60  ;;  %v2046_v57 = vld [vmem:[#allocation12 + $0x8] sm:$0xff]  ;;  %v3733_v59 = vpack.c.bf16 %v2062_v53, %v2061_v52  ;;  %v2064_v60 = vld [vmem:[#allocation14 + $0x18] sm:$0xff] }
 0x34e   :  { %3821 = vpow2.f32 %v1408_v58  ;;  %v2268_v52 = vld [vmem:[#allocation15 + $0x48] sm:$0xff] }
 0x34f   :  { %v1410_v2 = vmul.f32 1.442695, %v1399_v61  ;;  %v1412_v3 = vmul.f32 1.442695, %v1400_v63  ;;  %v2272_v53 = vld [vmem:[#allocation15 + $0x68] sm:$0xff] }
 0x350   :  { %v1389_v4 = vpop.xlane.xlu1 %1388  ;;  %v1392_v5 = vpop.xlane.xlu0 %1391 }
 0x351   :  { %3823 = vpow2.f32 %v1410_v2  ;;  %v1401_v7 = vsub.f32 %v1227_v39, %v1389_v4  ;;  %v1402_v8 = vsub.f32 %v1297_v42, %v1392_v5  ;;  %v2047_v2 = vld [vmem:[#allocation12 + $0x10] sm:$0xff]  ;;  %v2066_v5 = vld [vmem:[#allocation14 + $0x28] sm:$0xff] }
 0x352   :  { %3825 = vpow2.f32 %v1412_v3  ;;  %v2048_v3 = vld [vmem:[#allocation12 + $0x18] sm:$0xff] }
 0x353   :  { %v3818_v9 = vpop.eup %3817  ;;  %v1414_v11 = vmul.f32 1.442695, %v1401_v7  ;;  %v1416_v12 = vmul.f32 1.442695, %v1402_v8  ;;  %v3760_v7 = vpack.c.bf16 %v2048_v3, %v2047_v2  ;;  %v2049_v8 = vld [vmem:[#allocation12 + $0x20] sm:$0xff] }
 0x354   :  { %v1395_v41 = vpop.xlane.xlu1 %1394  ;;  %v1420_v14 = vsel %vm1371_vm1, %v3818_v9, 0.0 }
 0x355   :  { %3827 = vpow2.f32 %v1414_v11  ;;  %v1403_v16 = vsub.f32 %v1367_v46, %v1395_v41  ;;  %1421 = vadd.xlane.f32.xlu0 %v1420_v14  ;;  %v2051_v41 = vld [vmem:[#allocation12 + $0x30] sm:$0xff]  ;;  %v2052_v14 = vld [vmem:[#allocation12 + $0x38] sm:$0xff] }
 0x356   :  { %3829 = vpow2.f32 %v1416_v12 }
 0x357   :  { %v3820_v18 = vpop.eup %3819  ;;  %v1418_v19 = vmul.f32 1.442695, %v1403_v16  ;;  %v3766_v16 = vpack.c.bf16 %v2052_v14, %v2051_v41 }
 0x358   :  { %v3822_v21 = vpop.eup %3821  ;;  %v1423_v23 = vsel %vm1371_vm1, %v3820_v18, 0.0 }
 0x359   :  { %3831 = vpow2.f32 %v1418_v19  ;;  %1424 = vadd.xlane.f32.xlu1 %v1423_v23  ;;  %v1426_v24 = vsel %vm1371_vm1, %v3822_v21, 0.0  ;;  %v2056_v23 = vld [vmem:[#allocation12 + $0x58] sm:$0xff] }
 0x35a   :  { %1427 = vadd.xlane.f32.xlu0 %v1426_v24 }
 0x35b   :  { %v3824_v54 = vpop.eup %3823 }
 0x35c   :  { %v3826_v27 = vpop.eup %3825  ;;  %v1429_v28 = vsel %vm1371_vm1, %v3824_v54, 0.0 }
 0x35d   :  { %1430 = vadd.xlane.f32.xlu1 %v1429_v28  ;;  %v1432_v29 = vsel %vm1371_vm1, %v3826_v27, 0.0 }
 0x35e   :  { %1433 = vadd.xlane.f32.xlu0 %v1432_v29  ;;  %v2059_v29 = vld [vmem:[#allocation12 + $0x70] sm:$0xff] }
 0x35f   :  { %v3828_v25 = vpop.eup %3827 }
 0x360   :  { %v3830_v30 = vpop.eup %3829  ;;  %v1435_v31 = vsel %vm1371_vm1, %v3828_v25, 0.0 }
 0x361   :  { %1436 = vadd.xlane.f32.xlu1 %v1435_v31  ;;  %v1438_v32 = vsel %vm1371_vm1, %v3830_v30, 0.0  ;;  %v2067_v31 = vld [vmem:[#allocation14 + $0x30] sm:$0xff] }
 0x362   :  { %1439 = vadd.xlane.f32.xlu0 %v1438_v32  ;;  %v2068_v32 = vld [vmem:[#allocation14 + $0x38] sm:$0xff] }
 0x363   :  { %v4474_v33 = vpop.eup %3831 }
 0x364   :  { %v1441_v26 = vsel %vm1371_vm1, %v4474_v33, 0.0 }
 0x365   :  { %1442 = vadd.xlane.f32.xlu1 %v1441_v26  ;;  %v2069_v26 = vld [vmem:[#allocation14 + $0x40] sm:$0xff] }
 0x3e2   :  { %v1422_v34 = vpop.xlane.xlu0 %1421 }
 0x3e3   :  { %3833 = vrcp.f32 %v1422_v34  ;;  %v2070_v34 = vld [vmem:[#allocation14 + $0x48] sm:$0xff] }
 0x3e6   :  { %v1425_v35 = vpop.xlane.xlu1 %1424 }
 0x3e7   :  { %3835 = vrcp.f32 %v1425_v35  ;;  %v1428_v36 = vpop.xlane.xlu0 %1427  ;;  %v3745_v35 = vpack.c.bf16 %v2070_v34, %v2069_v26  ;;  %v2280_v34 = vld [vmem:[#allocation15 + $0xa8] sm:$0xff] }
 0x3e8   :  { %3837 = vrcp.f32 %v1428_v36  ;;  %v2071_v36 = vld [vmem:[#allocation14 + $0x50] sm:$0xff] }
 0x3ea   :  { %v1431_v37 = vpop.xlane.xlu1 %1430 }
 0x3eb   :  { %3839 = vrcp.f32 %v1431_v37  ;;  %v1434_v38 = vpop.xlane.xlu0 %1433  ;;  %v2072_v37 = vld [vmem:[#allocation14 + $0x58] sm:$0xff] }
 0x3ec   :  { %3841 = vrcp.f32 %v1434_v38  ;;  %v3748_v38 = vpack.c.bf16 %v2072_v37, %v2071_v36 }
 0x3ed   :  { %v3834_v39 = vpop.eup %3833 }
 0x3ee   :  { %v1445_v40 = vmul.f32 %v3834_v39, %v3818_v9  ;;  %v1437_v42 = vpop.xlane.xlu1 %1436  ;;  %v2050_v9 = vld [vmem:[#allocation12 + $0x28] sm:$0xff]  ;;  %v2073_v39 = vld [vmem:[#allocation14 + $0x60] sm:$0xff] }
 0x3ef   :  { %3843 = vrcp.f32 %v1437_v42  ;;  %v1440_v43 = vpop.xlane.xlu0 %1439  ;;  %v3763_v12 = vpack.c.bf16 %v2050_v9, %v2049_v8  ;;  %v2075_v42 = vld [vmem:[#allocation14 + $0x70] sm:$0xff] }
 0x3f0   :  { %3845 = vrcp.f32 %v1440_v43  ;;  %3481 = vmatmul.mubr.msk.f32.vlgmr.msra.gmra.mrb[12].mxu0 %vm1460_vm2, %v1445_v40  ;;  %v2076_v43 = vld [vmem:[#allocation14 + $0x78] sm:$0xff] }
 0x3f1   :  { %v3836_v44 = vpop.eup %3835  ;;  %3489 = vmatpush3.msra.mxu0 %v4415_v10  ;;  %3490 = vmatprep.mubr.msk.f32.mxu0 %vm4116_vm0, %v4117_v1 }
 0x3f2   :  { %v3838_v45 = vpop.eup %3837  ;;  %v1447_v46 = vmul.f32 %v3836_v44, %v3820_v18  ;;  %v1443_v47 = vpop.xlane.xlu1 %1442  ;;  %3498 = vmatprep.subr.mxu0 %v4117_v1  ;;  %v2054_v18 = vld [vmem:[#allocation12 + $0x48] sm:$0xff]  ;;  %v3754_v44 = vpack.c.bf16 %v2076_v43, %v2075_v42 }
 0x3f3   :  { %v1449_v48 = vmul.f32 %v3838_v45, %v3822_v21  ;;  %3847 = vrcp.f32 %v1443_v47  ;;  %v2055_v21 = vld [vmem:[#allocation12 + $0x50] sm:$0xff]  ;;  %v2259_v45 = vld [vmem:[#allocation15] sm:$0xff]  ;;  %v2260_v47 = vld [vmem:[#allocation15 + $0x8] sm:$0xff] }
 0x3f4   :  { %3486 = vmatmul.mubr.msk.f32.vlgmr.msra.gmra.mrb[12].mxu1 %vm1460_vm2, %v1447_v46  ;;  %v3772_v24 = vpack.c.bf16 %v2056_v23, %v2055_v21  ;;  %v2263_v46 = vld [vmem:[#allocation15 + $0x20] sm:$0xff]  ;;  %v2288_v42 = vld [vmem:[#allocation15 + $0xe8] sm:$0xff] }
 0x3f5   :  { %v3840_v49 = vpop.eup %3839  ;;  %3491 = vmatmul.mubr.msk.f32.vlgmr.msra.gmra.mrb[14].mxu0 %vm1460_vm2, %v1449_v48  ;;  %3494 = vmatpush3.msra.mxu1 %v4417_v13  ;;  %v2996_v48 = vcombine.low %v2259_v45, %v2263_v46 }
 0x3f6   :  { %v3842_v50 = vpop.eup %3841  ;;  %v1451_v51 = vmul.f32 %v3840_v49, %v3824_v54  ;;  %3495 = vmatprep.mubr.msk.f32.mxu1 %vm4116_vm0, %v4117_v1  ;;  %3499 = vmatpush3.msra.mxu0 %v4423_v15  ;;  %v2045_v15 = vld [vmem:[#allocation12] sm:$0xff]  ;;  %v2997_v49 = vcombine.high %v2259_v45, %v2263_v46 }
 0x3f7   :  { %v1453_v10 = vmul.f32 %v3842_v50, %v3826_v27  ;;  %3500 = vmatprep.mubr.msk.f32.mxu0 %vm4116_vm0, %v4117_v1  ;;  %3503 = vmatprep.subr.mxu1 %v4117_v1  ;;  %v2057_v54 = vld [vmem:[#allocation12 + $0x60] sm:$0xff]  ;;  %v2058_v27 = vld [vmem:[#allocation12 + $0x68] sm:$0xff] }
 0x3f8   :  { %3496 = vmatmul.mubr.msk.f32.vlgmr.msra.gmra.mrb[14].mxu1 %vm1460_vm2, %v1451_v51  ;;  %3508 = vmatprep.subr.mxu0 %v4117_v1  ;;  %v3775_v28 = vpack.c.bf16 %v2058_v27, %v2057_v54  ;;  %v2264_v50 = vld [vmem:[#allocation15 + $0x28] sm:$0xff]  ;;  %v2291_v46 = vld [vmem:[#allocation15 + $0x100] sm:$0xff] }
 0x3f9   :  { %v3844_v13 = vpop.eup %3843  ;;  %3501 = vmatmul.mubr.msk.f32.vlgmr.msra.gmra.mrb[16].mxu0 %vm1460_vm2, %v1453_v10  ;;  %3504 = vmatpush3.msra.mxu1 %v4429_v17  ;;  %v2063_v17 = vld [vmem:[#allocation14 + $0x10] sm:$0xff]  ;;  %v2998_v51 = vcombine.low %v2260_v47, %v2264_v50  ;;  %v2999_v10 = vcombine.high %v2260_v47, %v2264_v50  ;;  %v2295_v47 = vld [vmem:[#allocation15 + $0x120] sm:$0xff]  ;;  %v2296_v50 = vld [vmem:[#allocation15 + $0x128] sm:$0xff] }
 0x3fa   :  { %v3846_v55 = vpop.eup %3845  ;;  %v1455_v56 = vmul.f32 %v3844_v13, %v3828_v25  ;;  %3505 = vmatprep.mubr.msk.f32.mxu1 %vm4116_vm0, %v4117_v1  ;;  %3509 = vmatpush3.msra.mxu0 %v4435_v20  ;;  %v3757_v20 = vpack.c.bf16 %v2046_v57, %v2045_v15  ;;  %v3736_v4 = vpack.c.bf16 %v2064_v60, %v2063_v17  ;;  %v2060_v25 = vld [vmem:[#allocation12 + $0x78] sm:$0xff] }
 0x3fb   :  { %v1457_v58 = vmul.f32 %v3846_v55, %v3830_v30  ;;  %3510 = vmatprep.mubr.msk.f32.mxu0 %vm4116_vm0, %v4117_v1  ;;  %3513 = vmatprep.subr.mxu1 %v4117_v1  ;;  %v3778_v30 = vpack.c.bf16 %v2060_v25, %v2059_v29  ;;  %v3007_v13 = vcombine.high %v2268_v52, %v2272_v53 }
 0x3fc   :  { %3506 = vmatmul.mubr.msk.f32.vlgmr.msra.gmra.mrb[16].mxu1 %vm1460_vm2, %v1455_v56  ;;  %3732 = vmatprep.subr.bf16.mxu0 %v4115_v0  ;;  %v3006_v55 = vcombine.low %v2268_v52, %v2272_v53  ;;  %v2299_v53 = vld [vmem:[#allocation15 + $0x140] sm:$0xff] }
 0x3fd   :  { %v3848_v61 = vpop.eup %3847  ;;  %3511 = vmatmul.mubr.msk.f32.vlgmr.msra.gmra.mrb[18].mxu0 %vm1460_vm2, %v1457_v58  ;;  %3514 = vmatpush3.msra.mxu1 %v4441_v22  ;;  %v2065_v22 = vld [vmem:[#allocation14 + $0x20] sm:$0xff] }
 0x3fe   :  { %v1459_v63 = vmul.f32 %v3848_v61, %v4474_v33  ;;  %3515 = vmatprep.mubr.msk.f32.mxu1 %vm4116_vm0, %v4117_v1  ;;  %3756 = vmatprep.subr.bf16.mxu1 %v4115_v0  ;;  %v3739_v11 = vpack.c.bf16 %v2066_v5, %v2065_v22  ;;  %v3742_v33 = vpack.c.bf16 %v2068_v32, %v2067_v31  ;;  %v2275_v31 = vld [vmem:[#allocation15 + $0x80] sm:$0xff] }
 0x3ff   :  { %3734 = vmatpush3.bf16.msra.mxu0 %v3733_v59  ;;  %3550 = vmatprep.mubr.msk.f32.mxu0 %vm4116_vm0, %v4117_v1  ;;  %v2279_v32 = vld [vmem:[#allocation15 + $0xa0] sm:$0xff] }
 0x400   :  { %3516 = vmatmul.mubr.msk.f32.vlgmr.msra.gmra.mrb[18].mxu1 %vm1460_vm2, %v1459_v63  ;;  %3735 = vmatprep.subr.bf16.mxu0 %v4115_v0  ;;  %v3013_v26 = vcombine.high %v2275_v31, %v2279_v32 }
 0x401   :  { %3758 = vmatpush3.bf16.msra.mxu1 %v3757_v20  ;;  %3585 = vmatprep.mubr.msk.f32.mxu1 %vm4116_vm0, %v4117_v1  ;;  %v2053_v1 = vld [vmem:[#allocation12 + $0x40] sm:$0xff] }
 0x402   :  { %3759 = vmatprep.subr.bf16.mxu1 %v4115_v0  ;;  %v3769_v19 = vpack.c.bf16 %v2054_v18, %v2053_v1  ;;  %v2267_v18 = vld [vmem:[#allocation15 + $0x40] sm:$0xff] }
 0x403   :  { %3737 = vmatpush3.bf16.msra.mxu0 %v3736_v4 }
 0x404   :  { %3738 = vmatprep.subr.bf16.mxu0 %v4115_v0 }
 0x405   :  { %3761 = vmatpush3.bf16.msra.mxu1 %v3760_v7 }
 0x406   :  { %3762 = vmatprep.subr.bf16.mxu1 %v4115_v0 }
 0x407   :  { %3740 = vmatpush3.bf16.msra.mxu0 %v3739_v11 }
 0x408   :  { %3741 = vmatprep.subr.bf16.mxu0 %v4115_v0 }
 0x409   :  { %3764 = vmatpush3.bf16.msra.mxu1 %v3763_v12 }
 0x40a   :  { %3765 = vmatprep.subr.bf16.mxu1 %v4115_v0 }
 0x40b   :  { %3743 = vmatpush3.bf16.msra.mxu0 %v3742_v33  ;;  %v2276_v33 = vld [vmem:[#allocation15 + $0x88] sm:$0xff] }
 0x40c   :  { %3744 = vmatprep.subr.bf16.mxu0 %v4115_v0  ;;  %v3014_v36 = vcombine.low %v2276_v33, %v2280_v34  ;;  %v3015_v37 = vcombine.high %v2276_v33, %v2280_v34  ;;  %v2269_v33 = vld [vmem:[#allocation15 + $0x50] sm:$0xff]  ;;  %v2270_v34 = vld [vmem:[#allocation15 + $0x58] sm:$0xff] }
 0x40d   :  { %3767 = vmatpush3.bf16.msra.mxu1 %v3766_v16 }
 0x40e   :  { %3768 = vmatprep.subr.bf16.mxu1 %v4115_v0 }
 0x40f   :  { %3746 = vmatpush3.bf16.msra.mxu0 %v3745_v35  ;;  %v3012_v35 = vcombine.low %v2275_v31, %v2279_v32 }
 0x410   :  { %3747 = vmatprep.subr.bf16.mxu0 %v4115_v0 }
 0x411   :  { %3770 = vmatpush3.bf16.msra.mxu1 %v3769_v19  ;;  %v2271_v19 = vld [vmem:[#allocation15 + $0x60] sm:$0xff] }
 0x412   :  { %3771 = vmatprep.subr.bf16.mxu1 %v4115_v0  ;;  %v3005_v27 = vcombine.high %v2267_v18, %v2271_v19  ;;  %v3004_v29 = vcombine.low %v2267_v18, %v2271_v19  ;;  %v2262_v18 = vld [vmem:[#allocation15 + $0x18] sm:$0xff] }
 0x413   :  { %3749 = vmatpush3.bf16.msra.mxu0 %v3748_v38  ;;  %v2283_v38 = vld [vmem:[#allocation15 + $0xc0] sm:$0xff]  ;;  %v2266_v19 = vld [vmem:[#allocation15 + $0x38] sm:$0xff] }
 0x414   :  { %3750 = vmatprep.subr.bf16.mxu0 %v4115_v0 }
 0x415   :  { %3773 = vmatpush3.bf16.msra.mxu1 %v3772_v24 }
 0x416   :  { %3774 = vmatprep.subr.bf16.mxu1 %v4115_v0 }
 0x419   :  { %3776 = vmatpush3.bf16.msra.mxu1 %v3775_v28 }
 0x41a   :  { %3777 = vmatprep.subr.bf16.mxu1 %v4115_v0 }
 0x41d   :  { %3779 = vmatpush3.bf16.msra.mxu1 %v3778_v30 }
 0x41e   :  { %2684 = vmatprep.subr.bf16.mxu1 %v2999_v10 }
 0x420   :  { %3586 = vmatmul.mubr.f32.vlgmr.msra.gmra.mrb[20].mxu1 %v4409_v6  ;;  %v2074_v6 = vld [vmem:[#allocation14 + $0x68] sm:$0xff] }
 0x421   :  { %v3751_v40 = vpack.c.bf16 %v2074_v6, %v2073_v39  ;;  %2685 = vmatpush1.bf16.msra.mxu1 %v2998_v51  ;;  %v2287_v39 = vld [vmem:[#allocation15 + $0xe0] sm:$0xff]  ;;  %v2284_v6 = vld [vmem:[#allocation15 + $0xc8] sm:$0xff]  ;;  %v3028_v51 = vcombine.low %v2291_v46, %v2295_v47 }
 0x422   :  { %2686 = vmatprep.subr.bf16.mxu1 %v3007_v13  ;;  %v3020_v43 = vcombine.low %v2283_v38, %v2287_v39  ;;  %v3023_v45 = vcombine.high %v2284_v6, %v2288_v42  ;;  %v2303_v13 = vld [vmem:[#allocation15 + $0x160] sm:$0xff] }
 0x423   :  { %3752 = vmatpush3.bf16.msra.mxu0 %v3751_v40  ;;  %v3021_v40 = vcombine.high %v2283_v38, %v2287_v39  ;;  %v2277_v38 = vld [vmem:[#allocation15 + $0x90] sm:$0xff] }
 0x424   :  { %3753 = vmatprep.subr.bf16.mxu0 %v4115_v0  ;;  %v2281_v39 = vld [vmem:[#allocation15 + $0xb0] sm:$0xff] }
 0x425   :  { %2687 = vmatpush1.bf16.msra.mxu1 %v3006_v55  ;;  %v2300_v55 = vld [vmem:[#allocation15 + $0x148] sm:$0xff] }
 0x426   :  { %2688 = vmatprep.subr.bf16.mxu1 %v3015_v37 }
 0x427   :  { %3755 = vmatpush3.bf16.msra.mxu0 %v3754_v44  ;;  %v3022_v44 = vcombine.low %v2284_v6, %v2288_v42  ;;  %v2282_v42 = vld [vmem:[#allocation15 + $0xb8] sm:$0xff] }
 0x428   :  { %2643 = vmatprep.subr.bf16.mxu0 %v2997_v49  ;;  %v3029_v49 = vcombine.high %v2291_v46, %v2295_v47  ;;  %v2285_v46 = vld [vmem:[#allocation15 + $0xd0] sm:$0xff] }
 0x429   :  { %2689 = vmatpush1.bf16.msra.mxu1 %v3014_v36  ;;  %v2289_v47 = vld [vmem:[#allocation15 + $0xf0] sm:$0xff] }
 0x42a   :  { %2690 = vmatprep.subr.bf16.mxu1 %v3023_v45 }
 0x42d   :  { %2691 = vmatpush1.bf16.msra.mxu1 %v3022_v44  ;;  %v3017_v44 = vcombine.high %v2277_v38, %v2281_v39 }
 0x4c3   :  { %v1530_v0 = vpop.f32.mrb[12].mxu0 }
 0x4c4   :  { %v3482_v56 = vpop.f32.mrb[13].mxu0 }
 0x4c5   :  { %v2304_v56 = vld [vmem:[#allocation15 + $0x168] sm:$0xff] }
 0x4c7   :  { %v1603_v15 = vpop.f32.mrb[12].mxu1 }
 0x4c8   :  { %v2085_v57 = vrot.slane %v1603_v15, 7  ;;  %v1676_v58 = vpop.f32.mrb[14].mxu0  ;;  %v3487_v59 = vpop.f32.mrb[13].mxu1  ;;  %v3036_v15 = vcombine.low %v2299_v53, %v2303_v13 }
 0x4c9   :  { %v2088_v17 = vrot.slane %v1676_v58, 6  ;;  %v3492_v60 = vpop.f32.mrb[15].mxu0  ;;  %v3039_v58 = vcombine.high %v2300_v55, %v2304_v56  ;;  %v2307_v59 = vld [vmem:[#allocation15 + $0x180] sm:$0xff] }
 0x4ca   :  { %v2087_v61 = vsel %vm2086_vm3, %v2085_v57, %v1530_v0  ;;  %v3037_v0 = vcombine.high %v2299_v53, %v2303_v13  ;;  %v3038_v57 = vcombine.low %v2300_v55, %v2304_v56  ;;  %v2308_v60 = vld [vmem:[#allocation15 + $0x188] sm:$0xff]  ;;  %v2293_v53 = vld [vmem:[#allocation15 + $0x110] sm:$0xff]  ;;  %v2294_v55 = vld [vmem:[#allocation15 + $0x118] sm:$0xff]  ;;  %v3024_v56 = vcombine.low %v2285_v46, %v2289_v47 }
 0x4cb   :  { %v2090_v20 = vsel %vm2089_vm4, %v2088_v17, %v2087_v61  ;;  %v1749_v63 = vpop.f32.mrb[14].mxu1  ;;  %v2311_v17 = vld [vmem:[#allocation15 + $0x1a0] sm:$0xff]  ;;  %v2297_v13 = vld [vmem:[#allocation15 + $0x130] sm:$0xff] }
 0x4cc   :  { %v2091_v2 = vrot.slane %v1749_v63, 5  ;;  %v1822_v3 = vpop.f32.mrb[16].mxu0  ;;  %v3497_v4 = vpop.f32.mrb[15].mxu1  ;;  %v3045_v61 = vcombine.high %v2307_v59, %v2311_v17  ;;  %v3044_v63 = vcombine.low %v2307_v59, %v2311_v17  ;;  %v2301_v59 = vld [vmem:[#allocation15 + $0x150] sm:$0xff] }
 0x4cd   :  { %v2094_v22 = vrot.slane %v1822_v3, 4  ;;  %v3502_v5 = vpop.f32.mrb[17].mxu0  ;;  %v2315_v4 = vld [vmem:[#allocation15 + $0x1c0] sm:$0xff]  ;;  %v2305_v17 = vld [vmem:[#allocation15 + $0x170] sm:$0xff] }
 0x4ce   :  { %v2093_v7 = vsel %vm2092_vm5, %v2091_v2, %v2090_v20  ;;  %v2312_v20 = vld [vmem:[#allocation15 + $0x1a8] sm:$0xff] }
 0x4cf   :  { %v2096_v8 = vsel %vm2095_vm6, %v2094_v22, %v2093_v7  ;;  %v1895_v9 = vpop.f32.mrb[16].mxu1  ;;  %v3046_v2 = vcombine.low %v2308_v60, %v2312_v20  ;;  %v3047_v3 = vcombine.high %v2308_v60, %v2312_v20  ;;  %v2319_v22 = vld [vmem:[#allocation15 + $0x1e0] sm:$0xff]  ;;  %v2316_v5 = vld [vmem:[#allocation15 + $0x1c8] sm:$0xff]  ;;  %v2302_v60 = vld [vmem:[#allocation15 + $0x158] sm:$0xff]  ;;  %v3032_v20 = vcombine.low %v2293_v53, %v2297_v13 }
 0x4d0   :  { %v2097_v11 = vrot.slane %v1895_v9, 3  ;;  %v1968_v12 = vpop.f32.mrb[18].mxu0  ;;  %v3507_v41 = vpop.f32.mrb[17].mxu1  ;;  %v3052_v7 = vcombine.low %v2315_v4, %v2319_v22  ;;  %v2320_v9 = vld [vmem:[#allocation15 + $0x1e8] sm:$0xff] }
 0x4d1   :  { %v2100_v14 = vrot.slane %v1968_v12, 2  ;;  %v3512_v16 = vpop.f32.mrb[19].mxu0  ;;  %v2265_v12 = vld [vmem:[#allocation15 + $0x30] sm:$0xff]  ;;  %v3054_v41 = vcombine.low %v2316_v5, %v2320_v9 }
 0x4d2   :  { %v2099_v1 = vsel %vm2098_vm7, %v2097_v11, %v2096_v8  ;;  %v3053_v8 = vcombine.high %v2315_v4, %v2319_v22  ;;  %v2261_v11 = vld [vmem:[#allocation15 + $0x10] sm:$0xff]  ;;  %v4119_v16 = vmov 0  }
 0x4d3   :  { %v2102_v21 = vsel %vm2101_vm8, %v2100_v14, %v2099_v1  ;;  %v2041_v23 = vpop.f32.mrb[18].mxu1  ;;  %v3055_v14 = vcombine.high %v2316_v5, %v2320_v9  ;;  %v3000_v1 = vcombine.low %v2261_v11, %v2265_v12  ;;  %2716 = vmatprep.mubr.bf16.mxu1 %v4119_v16  ;;  %v2309_v4 = vld [vmem:[#allocation15 + $0x190] sm:$0xff]  ;;  %v2310_v5 = vld [vmem:[#allocation15 + $0x198] sm:$0xff] }
 0x4d4   :  { %v2103_v24 = vrot.slane %v2041_v23, 1  ;;  %v3517_v54 = vpop.f32.mrb[19].mxu1  ;;  %v3002_v23 = vcombine.low %v2262_v18, %v2266_v19  ;;  %v2313_v22 = vld [vmem:[#allocation15 + $0x1b0] sm:$0xff] }
 0x4d6   :  { %v2105_v28 = vsel %vm2104_vm9, %v2103_v24, %v2102_v21  ;;  %v3001_v21 = vcombine.high %v2261_v11, %v2265_v12  ;;  %v3003_v24 = vcombine.high %v2262_v18, %v2266_v19  ;;  %v3049_v11 = vcombine.high %v2309_v4, %v2313_v22 }
 0x4d7   :  { %3551 = vmatmul.mubr.f32.vlgmr.msra.gmra.mrb[20].mxu0 %v2105_v28  ;;  %v3048_v18 = vcombine.low %v2309_v4, %v2313_v22 }
 0x4d8   :  { %2644 = vmatpush1.bf16.msra.mxu0 %v2996_v48  ;;  %v2292_v48 = vld [vmem:[#allocation15 + $0x108] sm:$0xff]  ;;  %2675 = vmatprep.mubr.bf16.mxu0 %v4119_v16 }
 0x4d9   :  { %2645 = vmatprep.subr.bf16.mxu0 %v3005_v27  ;;  %v3030_v10 = vcombine.low %v2292_v48, %v2296_v50  ;;  %v3031_v52 = vcombine.high %v2292_v48, %v2296_v50  ;;  %v2995_v27 = vld [vmem:[%s4586_s9] ss:$0 sm:$0xff]  ;;  %v2286_v48 = vld [vmem:[#allocation15 + $0xd8] sm:$0xff]  ;;  %v3016_v50 = vcombine.low %v2277_v38, %v2281_v39  ;;  %v2839_v39 = vsub.s32 1, %v4405_v62 }
 0x4da   :  { %v2831_v38 = vld [vmem:[%s4588_s11] sm:$0xff]  ;;  %s4120_s11 = smov [#allocation18]  }
 0x4db   :  { %2692 = vmatprep.subr.bf16.mxu1 %v3031_v52  ;;  %s2956_s23 = sshll.u32 %s4120_s11, 4  ;;  %s2957_s23 = int_to_ptr.vmem [resolvable:$true] %s2956_s23 }
 0x4dc   :  { %2646 = vmatpush1.bf16.msra.mxu0 %v3004_v29  ;;  %2693 = vmatpush1.bf16.msra.mxu1 %v3030_v10  ;;  %v3025_v10 = vcombine.high %v2285_v46, %v2289_v47  ;;  %v2840_v46 = vrot.slane %v2831_v38, %v2839_v39  ;;  %s4045_s25 = scalar_lea.vmem %s2957_s23, 128  ;;  %p4050_p9 = scmp.lt.s32.totalorder %s2957_s23, %s2957_s23 }
 0x4dd   :  { %2647 = vmatprep.subr.bf16.mxu0 %v3013_v26  ;;  %2694 = vmatprep.subr.bf16.mxu1 %v3039_v58  ;;  %v2273_v26 = vld [vmem:[#allocation15 + $0x70] sm:$0xff]  ;;  %p4046_p8 = scmp.ne.s32.totalorder %s2957_s23, %s4045_s25  ;;  %p4051_p10 = scmp.lt.s32.totalorder %s4045_s25, %s4045_s25 }
 0x4de   :  { %v3009_v36 = vcombine.high %v2269_v33, %v2273_v26 }
 0x4df   :  { %p4052_p11 = por %p4051_p10, %p4050_p9 }
 0x4e0   :  { %2648 = vmatpush1.bf16.msra.mxu0 %v3012_v35  ;;  %2695 = vmatpush1.bf16.msra.mxu1 %v3038_v57  ;;  %v2274_v35 = vld [vmem:[#allocation15 + $0x78] sm:$0xff]  ;;  %v3033_v57 = vcombine.high %v2293_v53, %v2297_v13 }
 0x4e1   :  { %2649 = vmatprep.subr.bf16.mxu0 %v3021_v40  ;;  %2696 = vmatprep.subr.bf16.mxu1 %v3047_v3  ;;  %v3011_v37 = vcombine.high %v2270_v34, %v2274_v35  ;;  %v2278_v40 = vld [vmem:[#allocation15 + $0x98] sm:$0xff]  ;;  %p4053_p12 = pnand %p4052_p11, %p4046_p8 }
 0x4e2   :  { %v3019_v45 = vcombine.high %v2278_v40, %v2282_v42 }
 0x4e4   :  { %2650 = vmatpush1.bf16.msra.mxu0 %v3020_v43  ;;  %2697 = vmatpush1.bf16.msra.mxu1 %v3046_v2  ;;  %v3010_v43 = vcombine.low %v2270_v34, %v2274_v35  ;;  %v3041_v2 = vcombine.high %v2301_v59, %v2305_v17  ;;  %v2835_v34 = vsub.s32 0, %v4405_v62  ;;  %v2843_v35 = vsub.s32 2, %v4405_v62 }
 0x4e5   :  { %2651 = vmatprep.subr.bf16.mxu0 %v3029_v49  ;;  %2698 = vmatprep.subr.bf16.mxu1 %v3055_v14  ;;  %v2290_v49 = vld [vmem:[#allocation15 + $0xf8] sm:$0xff]  ;;  %v2321_v14 = vld [vmem:[#allocation15 + $0x1f0] sm:$0xff] }
 0x4e6   :  { %v3027_v52 = vcombine.high %v2286_v48, %v2290_v49 }
 0x4e8   :  { %2652 = vmatpush1.bf16.msra.mxu0 %v3028_v51  ;;  %2699 = vmatpush1.bf16.msra.mxu1 %v3054_v41  ;;  %v3018_v51 = vcombine.low %v2278_v40, %v2282_v42  ;;  %v2317_v41 = vld [vmem:[#allocation15 + $0x1d0] sm:$0xff]  ;;  %v2855_v40 = vsub.s32 5, %v4405_v62  ;;  %v2863_v42 = vsub.s32 7, %v4405_v62 }
 0x4e9   :  { %2653 = vmatprep.subr.bf16.mxu0 %v3037_v0  ;;  %2766 = vmatprep.subr.bf16.mxu1 %v3003_v24  ;;  %v2298_v0 = vld [vmem:[#allocation15 + $0x138] sm:$0xff]  ;;  %v3056_v24 = vcombine.low %v2317_v41, %v2321_v14 }
 0x4ea   :  { %v3035_v58 = vcombine.high %v2294_v55, %v2298_v0 }
 0x4ec   :  { %2654 = vmatpush1.bf16.msra.mxu0 %v3036_v15  ;;  %v3026_v15 = vcombine.low %v2286_v48, %v2290_v49  ;;  %v2856_v48 = vrot.slane %v2831_v38, %v2855_v40  ;;  %v2864_v49 = vrot.slane %v2831_v38, %v2863_v42 }
 0x4ed   :  { %2655 = vmatprep.subr.bf16.mxu0 %v3045_v61  ;;  %v2306_v61 = vld [vmem:[#allocation15 + $0x178] sm:$0xff] }
 0x4ee   :  { %v3043_v3 = vcombine.high %v2302_v60, %v2306_v61  ;;  %v3042_v9 = vcombine.low %v2302_v60, %v2306_v61 }
 0x4f0   :  { %2656 = vmatpush1.bf16.msra.mxu0 %v3044_v63  ;;  %v3034_v63 = vcombine.low %v2294_v55, %v2298_v0 }
 0x4f1   :  { %2657 = vmatprep.subr.bf16.mxu0 %v3053_v8  ;;  %v3040_v8 = vcombine.low %v2301_v59, %v2305_v17 }
 0x4f3   :  { %v4530_v25 = vpop.f32.mrb[20].mxu1 }
 0x4f4   :  { %v3587_v30 = vpop.f32.mrb[21].mxu1  ;;  %2658 = vmatpush1.bf16.msra.mxu0 %v3052_v7  ;;  %v2314_v7 = vld [vmem:[#allocation15 + $0x1b8] sm:$0xff] }
 0x4f5   :  { %2725 = vmatprep.subr.bf16.mxu0 %v3001_v21  ;;  %v3051_v12 = vcombine.high %v2310_v5, %v2314_v7  ;;  %v3050_v19 = vcombine.low %v2310_v5, %v2314_v7  ;;  %v3057_v21 = vcombine.high %v2317_v41, %v2321_v14 }
 0x5aa   :  { %v2173_v54 = vpop.f32.mrb[20].mxu0 }
 0x5ab   :  { %v2244_v28 = vadd.f32 %v4530_v25, %v2173_v54  ;;  %v3552_v29 = vpop.f32.mrb[21].mxu0  ;;  %v3008_v25 = vcombine.low %v2269_v33, %v2273_v26 }
 0x5ad   :  { %v2254_v30 = vadd.f32 %v2995_v27, %v2244_v28 }
 0x5af   :  { %3849 = vtanh.f32 %v2254_v30 }
 0x5b9   :  { %v3850_v31 = vpop.eup %3849 }
 0x5ba   :  { %v2256_v32 = vpack.c.bf16 %v3850_v31, %v3850_v31 }
 0x5bc   :  { %2257 = vst [vmem:[#allocation2] sm:$0xf] %v2256_v32 }
 0x5c3   :  { %v4536_v6 = vld [vmem:[#allocation2] sm:$0xf] }
 0x5c4   :  { %2676 = vmatmul.mubr.bf16.vlgmr.msra.gmra.mrb[24].mxu0 %v4536_v6  ;;  %2717 = vmatmul.mubr.bf16.vlgmr.msra.gmra.mrb[24].mxu1 %v4536_v6 }
 0x5c5   :  { %2726 = vmatpush1.bf16.msra.mxu0 %v3000_v1  ;;  %2767 = vmatpush1.bf16.msra.mxu1 %v3002_v23  ;;  %v2322_v1 = vld [vmem:[#allocation15 + $0x1f8] sm:$0xff] }
 0x5c6   :  { %2727 = vmatprep.subr.bf16.mxu0 %v3009_v36  ;;  %2768 = vmatprep.subr.bf16.mxu1 %v3011_v37  ;;  %v2851_v36 = vsub.s32 4, %v4405_v62  ;;  %v2859_v37 = vsub.s32 6, %v4405_v62 }
 0x5c7   :  { %2757 = vmatprep.mubr.bf16.mxu0 %v4119_v16  ;;  %2798 = vmatprep.mubr.bf16.mxu1 %v4119_v16  ;;  %v2318_v16 = vld [vmem:[#allocation15 + $0x1d8] sm:$0xff] }
 0x5c8   :  { %v3059_v23 = vcombine.high %v2318_v16, %v2322_v1  ;;  %v3058_v54 = vcombine.low %v2318_v16, %v2322_v1 }
 0x5c9   :  { %2728 = vmatpush1.bf16.msra.mxu0 %v3008_v25  ;;  %2769 = vmatpush1.bf16.msra.mxu1 %v3010_v43  ;;  %v2836_v25 = vrot.slane %v2831_v38, %v2835_v34  ;;  %v2844_v43 = vrot.slane %v2831_v38, %v2843_v35 }
 0x5ca   :  { %2729 = vmatprep.subr.bf16.mxu0 %v3017_v44  ;;  %2770 = vmatprep.subr.bf16.mxu1 %v3019_v45  ;;  %v2852_v44 = vrot.slane %v2831_v38, %v2851_v36  ;;  %v2860_v45 = vrot.slane %v2831_v38, %v2859_v37 }
 0x5cd   :  { %2730 = vmatpush1.bf16.msra.mxu0 %v3016_v50  ;;  %2771 = vmatpush1.bf16.msra.mxu1 %v3018_v51 }
 0x5ce   :  { %2731 = vmatprep.subr.bf16.mxu0 %v3025_v10  ;;  %2772 = vmatprep.subr.bf16.mxu1 %v3027_v52 }
 0x5d1   :  { %2732 = vmatpush1.bf16.msra.mxu0 %v3024_v56  ;;  %2773 = vmatpush1.bf16.msra.mxu1 %v3026_v15 }
 0x5d2   :  { %2733 = vmatprep.subr.bf16.mxu0 %v3033_v57  ;;  %2774 = vmatprep.subr.bf16.mxu1 %v3035_v58 }
 0x5d5   :  { %2734 = vmatpush1.bf16.msra.mxu0 %v3032_v20  ;;  %2775 = vmatpush1.bf16.msra.mxu1 %v3034_v63 }
 0x5d6   :  { %2735 = vmatprep.subr.bf16.mxu0 %v3041_v2  ;;  %2776 = vmatprep.subr.bf16.mxu1 %v3043_v3 }
 0x5d9   :  { %2736 = vmatpush1.bf16.msra.mxu0 %v3040_v8  ;;  %2777 = vmatpush1.bf16.msra.mxu1 %v3042_v9 }
 0x5da   :  { %2737 = vmatprep.subr.bf16.mxu0 %v3049_v11  ;;  %2778 = vmatprep.subr.bf16.mxu1 %v3051_v12 }
 0x5dd   :  { %2738 = vmatpush1.bf16.msra.mxu0 %v3048_v18  ;;  %2779 = vmatpush1.bf16.msra.mxu1 %v3050_v19 }
 0x5de   :  { %2739 = vmatprep.subr.bf16.mxu0 %v3057_v21  ;;  %2780 = vmatprep.subr.bf16.mxu1 %v3059_v23 }
 0x5e1   :  { %2740 = vmatpush1.bf16.msra.mxu0 %v3056_v24  ;;  %2781 = vmatpush1.bf16.msra.mxu1 %v3058_v54 }
 0x5e4   :  { %2758 = vmatmul.mubr.bf16.vlgmr.msra.gmra.mrb[28].mxu0 %v4536_v6  ;;  %2799 = vmatmul.mubr.bf16.vlgmr.msra.gmra.mrb[28].mxu1 %v4536_v6  ;;  %v2847_v6 = vsub.s32 3, %v4405_v62 }
 0x5e6   :  { %v2848_v47 = vrot.slane %v2831_v38, %v2847_v6 }
 0x697   :  { %v2677_v27 = vpop.f32.mrb[24].mxu0  ;;  %v2718_v28 = vpop.f32.mrb[24].mxu1 }
 0x698   :  { %v2679_v29 = vpop.f32.mrb[25].mxu0  ;;  %v2720_v30 = vpop.f32.mrb[25].mxu1  ;;  %v2873_v53 = vadd.f32 %v2836_v25, %v2677_v27  ;;  %v2875_v13 = vadd.f32 %v2844_v43, %v2718_v28 }
 0x699   :  { %v2681_v31 = vpop.f32.mrb[26].mxu0  ;;  %v2722_v32 = vpop.f32.mrb[26].mxu1  ;;  %v2874_v57 = vadd.f32 %v2840_v46, %v2679_v29  ;;  %v2876_v62 = vadd.f32 %v2848_v47, %v2720_v30 }
 0x69a   :  { %v2682_v33 = vpop.f32.mrb[27].mxu0  ;;  %v2723_v26 = vpop.f32.mrb[27].mxu1 }
 0x6b7   :  { %v2759_v50 = vpop.f32.mrb[28].mxu0  ;;  %v2800_v51 = vpop.f32.mrb[28].mxu1 }
 0x6b8   :  { %v2761_v10 = vpop.f32.mrb[29].mxu0  ;;  %v2802_v52 = vpop.f32.mrb[29].mxu1  ;;  %v2877_v55 = vadd.f32 %v2852_v44, %v2759_v50  ;;  %v2879_v0 = vadd.f32 %v2860_v45, %v2800_v51 }
 0x6b9   :  { %v2763_v56 = vpop.f32.mrb[30].mxu0  ;;  %v2804_v15 = vpop.f32.mrb[30].mxu1  ;;  %v2878_v58 = vadd.f32 %v2856_v48, %v2761_v10  ;;  %v2880_v59 = vadd.f32 %v2864_v49, %v2802_v52 }
 0x6ba   :  { %v2764_v17 = vpop.f32.mrb[31].mxu0  ;;  %v2805_v60 = vpop.f32.mrb[31].mxu1  ;;  %v2881_v61 = vmax.f32 %v2873_v53, %v2877_v55  ;;  %v2883_v20 = vmax.f32 %v2875_v13, %v2879_v0 }
 0x6bb   :  { %v2882_v63 = vmax.f32 %v2874_v57, %v2878_v58  ;;  %v2884_v2 = vmax.f32 %v2876_v62, %v2880_v59 }
 0x6bd   :  { %v2885_v3 = vmax.f32 %v2881_v61, %v2882_v63  ;;  %v2886_v4 = vmax.f32 %v2883_v20, %v2884_v2 }
 0x6bf   :  { %v2887_v22 = vmax.f32 %v2885_v3, %v2886_v4 }
 0x6c1   :  { %2888 = vmax.xlane.f32.xlu0 %v2887_v22 }
 0x74e   :  { %v2889_v5 = vpop.xlane.xlu0 %2888 }
 0x74f   :  { %v2890_v7 = vsub.f32 %v2873_v53, %v2889_v5  ;;  %v2891_v8 = vsub.f32 %v2874_v57, %v2889_v5  ;;  %v2892_v9 = vsub.f32 %v2875_v13, %v2889_v5  ;;  %v2893_v11 = vsub.f32 %v2876_v62, %v2889_v5 }
 0x750   :  { %v2894_v14 = vsub.f32 %v2877_v55, %v2889_v5  ;;  %v2895_v1 = vsub.f32 %v2878_v58, %v2889_v5  ;;  %v2896_v21 = vsub.f32 %v2879_v0, %v2889_v5  ;;  %v2897_v24 = vsub.f32 %v2880_v59, %v2889_v5 }
 0x751   :  { %v2898_v12 = vmul.f32 1.442695, %v2890_v7  ;;  %v2900_v41 = vmul.f32 1.442695, %v2891_v8  ;;  %v2902_v16 = vmul.f32 1.442695, %v2892_v9 }
 0x752   :  { %v2904_v18 = vmul.f32 1.442695, %v2893_v11  ;;  %v2906_v19 = vmul.f32 1.442695, %v2894_v14  ;;  %v2908_v23 = vmul.f32 1.442695, %v2895_v1 }
 0x753   :  { %3851 = vpow2.f32 %v2898_v12  ;;  %v2910_v54 = vmul.f32 1.442695, %v2896_v21  ;;  %v2912_v27 = vmul.f32 1.442695, %v2897_v24 }
 0x754   :  { %3853 = vpow2.f32 %v2900_v41 }
 0x755   :  { %3855 = vpow2.f32 %v2902_v16 }
 0x756   :  { %3857 = vpow2.f32 %v2904_v18 }
 0x757   :  { %3859 = vpow2.f32 %v2906_v19 }
 0x758   :  { %3861 = vpow2.f32 %v2908_v23 }
 0x759   :  { %3863 = vpow2.f32 %v2910_v54 }
 0x75a   :  { %3865 = vpow2.f32 %v2912_v27 }
 0x75d   :  { %v3852_v28 = vpop.eup %3851 }
 0x75e   :  { %v3854_v29 = vpop.eup %3853 }
 0x75f   :  { %v2914_v30 = vadd.f32 %v3854_v29, %v3852_v28  ;;  %v3856_v31 = vpop.eup %3855 }
 0x760   :  { %v3858_v33 = vpop.eup %3857 }
 0x761   :  { %v2915_v32 = vadd.f32 %v3856_v31, %v2914_v30  ;;  %v3860_v34 = vpop.eup %3859 }
 0x762   :  { %v3862_v36 = vpop.eup %3861 }
 0x763   :  { %v2916_v26 = vadd.f32 %v3858_v33, %v2915_v32  ;;  %v3864_v38 = vpop.eup %3863 }
 0x764   :  { %v3866_v6 = vpop.eup %3865 }
 0x765   :  { %v2917_v35 = vadd.f32 %v3860_v34, %v2916_v26 }
 0x767   :  { %v2918_v37 = vadd.f32 %v3862_v36, %v2917_v35 }
 0x769   :  { %v2919_v39 = vadd.f32 %v3864_v38, %v2918_v37 }
 0x76b   :  { %v2920_v40 = vadd.f32 %v3866_v6, %v2919_v39 }
 0x76d   :  { %2921 = vadd.xlane.f32.xlu1 %v2920_v40 }
 0x76e   :  { %4056 = shalt.err (!%p4053_p12)
}
 0x76f   :  { %s4057_s3 = scalar_lea.hbm %s4590_s13, 128 }
 0x770   :  { %p4058_p13 = scmp.ne.s32.totalorder %s4590_s13, %s4057_s3  ;;  %p4061_p0 = scmp.lt.u32.totalorder %s4057_s3, %s4590_s13 }
 0x772   :  { %p4063_p1 = pnand %p4061_p0, %p4058_p13 }
 0x774   :  { %4066 = shalt.err (!%p4063_p1)
}
 0x775   :  { %2959 = dma.vmem_to_hbm [thread:$0]  %s2957_s23, 128, %s4590_s13, [#allocation19]  }
 0x776   :  { %s4121_s22 = smov [#allocation17]  }
 0x777   :  { %s2946_s10 = sshll.u32 %s4121_s22, 4  ;;  %s2947_s10 = int_to_ptr.vmem [resolvable:$true] %s2946_s10 }
 0x778   :  { %s4067_s13 = scalar_lea.vmem %s2947_s10, 1024  ;;  %p4072_p3 = scmp.lt.s32.totalorder %s2947_s10, %s2947_s10 }
 0x779   :  { %p4068_p2 = scmp.ne.s32.totalorder %s2947_s10, %s4067_s13  ;;  %p4073_p4 = scmp.lt.s32.totalorder %s4067_s13, %s4067_s13 }
 0x77b   :  { %p4074_p5 = por %p4073_p4, %p4072_p3 }
 0x77d   :  { %p4075_p6 = pnand %p4074_p5, %p4068_p2 }
 0x7fa   :  { %v2922_v42 = vpop.xlane.xlu1 %2921 }
 0x7fb   :  { %3867 = vrcp.f32 %v2922_v42 }
 0x805   :  { %v3868_v25 = vpop.eup %3867 }
 0x806   :  { %v2924_v43 = vmul.f32 %v3868_v25, %v3852_v28  ;;  %v2925_v44 = vmul.f32 %v3868_v25, %v3854_v29  ;;  %v2926_v45 = vmul.f32 %v3868_v25, %v3856_v31  ;;  %v2927_v46 = vmul.f32 %v3868_v25, %v3858_v33 }
 0x807   :  { %v2928_v47 = vmul.f32 %v3868_v25, %v3860_v34  ;;  %v2929_v48 = vmul.f32 %v3868_v25, %v3862_v36  ;;  %v2930_v49 = vmul.f32 %v3868_v25, %v3864_v38  ;;  %v2931_v50 = vmul.f32 %v3868_v25, %v3866_v6 }
 0x808   :  { %2932 = vst [vmem:[#allocation17] sm:$0xff] %v2924_v43  ;;  %2933 = vst [vmem:[#allocation17 + $0x8] sm:$0xff] %v2925_v44 }
 0x809   :  { %2934 = vst [vmem:[#allocation17 + $0x10] sm:$0xff] %v2926_v45  ;;  %2935 = vst [vmem:[#allocation17 + $0x18] sm:$0xff] %v2927_v46 }
 0x80a   :  { %2936 = vst [vmem:[#allocation17 + $0x20] sm:$0xff] %v2928_v47  ;;  %2937 = vst [vmem:[#allocation17 + $0x28] sm:$0xff] %v2929_v48 }
 0x80b   :  { %2938 = vst [vmem:[#allocation17 + $0x30] sm:$0xff] %v2930_v49  ;;  %2939 = vst [vmem:[#allocation17 + $0x38] sm:$0xff] %v2931_v50 }
 0x80c   :  { %4078 = shalt.err (!%p4075_p6)
}
 0x80d   :  { %s4079_s16 = scalar_lea.hbm %s4589_s12, 1024 }
 0x80e   :  { %p4080_p7 = scmp.ne.s32.totalorder %s4589_s12, %s4079_s16  ;;  %p4083_p8 = scmp.lt.u32.totalorder %s4079_s16, %s4589_s12 }
 0x810   :  { %p4085_p9 = pnand %p4083_p8, %p4080_p7 }
 0x812   :  { %4088 = shalt.err (!%p4085_p9)
}
 0x813   :  { %2949 = dma.vmem_to_hbm [thread:$0]  %s2947_s10, 1024, %s4589_s12, [#allocation5]  }
 0x814   :  { %4099 = dma.done.wait [#allocation5], 1024  }
 0x815   :  { %4100 = vsyncadd [#allocation5], 4294966272 }
 0x816   :  { %4101 = dma.done.wait [#allocation19], 128  }
 0x817   :  { %4102 = vsyncadd [#allocation19], 4294967168 }
 0x818   :  { %2966 = vsyncpa [#allocation4], 1 }
 0x819   :  { %2967 = vsyncpa [#allocation7], 1 }
 0x81a   :  { %2968 = vsyncpa [#allocation10], 1 }
 0x81b   :  { %2969 = vsyncpa [#allocation13], 1 }
 0x81c   :  { %2970 = vsyncpa [#allocation16], 1 }
 0x81d   :  { %2971 = vsyncpa [#allocation5], 1 }
 0x81e   :  { %2972 = vsyncpa [#allocation19], 1 }

</bundles_post_ra>
